<compile_context>
chip_gen: v5e
topology: v5e:2x2
jax: 0.10.0
libtpu: 0.0.40
codegen_flags: <defaults>
</compile_context>

<pallas_src>
import functools

import jax
import jax.numpy as jnp
from jax.experimental import pallas as pl
from jax.experimental.pallas import tpu as pltpu

HIDDEN = 256
BN_EPS = 1e-5
TILE_B = 256            # batch tile for the gridded throughput path
FUSED_MAX_B = 256       # batches up to this size use the single fused call
VMEM_LIMIT = 32 * 1024 * 1024

# Row indices inside the packed (VEC_ROWS, 2*HIDDEN) f32 per-feature array
# used by the fused single-call kernel.
(_B1, _G1, _BE1,
 _B2, _G2, _BE2,
 _B3, _G3, _BE3,
 _BH, _BOUT) = range(11)
VEC_ROWS = 16           # padded to a multiple of 8 sublanes


def _swish(h):
    return h * jax.nn.sigmoid(h)        # f32 on VPU/EUP


def _mm(h, w):
    # bf16 MXU inputs, f32 accumulation.
    return jnp.dot(h.astype(jnp.bfloat16), w, preferred_element_type=jnp.float32)


# ---------------------------------------------------------------------------
# Latency path (B <= 256): whole batch resident in VMEM, one fused kernel.
# ---------------------------------------------------------------------------
def _fused_kernel(x_ref, w1_ref, w23_ref, wh_ref, wout_ref, vec_ref, out_ref,
                  *, out_pad):
    x = x_ref[...]                       # (B, in_pad) f32
    vecs = vec_ref[...]                  # (VEC_ROWS, 2*HIDDEN) f32

    def row(i, n=HIDDEN):
        return vecs[i:i + 1, :n]

    def bn_swish(h, gi, bi):
        # training-mode BatchNorm1d over the whole batch; one pass with clamped
        # variance, affine folded into scale/shift.
        mean = jnp.mean(h, axis=0, keepdims=True)
        var = jnp.maximum(jnp.mean(h * h, axis=0, keepdims=True) - mean * mean, 0.0)
        scale = row(gi) * jax.lax.rsqrt(var + BN_EPS)
        shift = row(bi) - mean * scale
        return _swish(h * scale + shift)

    # trunk: Linear -> BN(train) -> swish, x3   (w2 | w3 stacked in one slab)
    h = bn_swish(_mm(x, w1_ref[...]) + row(_B1), _G1, _BE1)
    h = bn_swish(_mm(h, w23_ref[:HIDDEN, :]) + row(_B2), _G2, _BE2)
    h = bn_swish(_mm(h, w23_ref[HIDDEN:, :]) + row(_B3), _G3, _BE3)

    # fused heads: [actor_2 | critic_2] both act on the trunk output (per the
    # PyTorch forward; actor_1 / critic_1 outputs are dead and skipped).
    hc = _swish(_mm(h, wh_ref[...]) + row(_BH, 2 * HIDDEN))        # (B, 512)

    # block-diagonal lane-dense output: lanes [0:output_size] = policy,
    # lane [output_size] = value.
    out_ref[...] = _mm(hc, wout_ref[...]) + row(_BOUT, out_pad)


def _fused_call(x, kp, out_pad):
    B, in_pad = x.shape
    vmem = pl.BlockSpec(memory_space=pltpu.MemorySpace.VMEM)
    flops = 2 * B * (in_pad * HIDDEN + 2 * HIDDEN * HIDDEN
                     + HIDDEN * 2 * HIDDEN + 2 * HIDDEN * out_pad)
    trans = B * (3 * HIDDEN + 2 * HIDDEN)
    bytes_acc = (4 * x.size
                 + 2 * (kp["w1"].size + kp["w23"].size + kp["wh"].size
                        + kp["wout"].size)
                 + 4 * kp["vecs"].size + 4 * B * out_pad)
    return pl.pallas_call(
        functools.partial(_fused_kernel, out_pad=out_pad),
        out_shape=jax.ShapeDtypeStruct((B, out_pad), jnp.float32),
        in_specs=[vmem] * 6,
        out_specs=vmem,
        compiler_params=pltpu.CompilerParams(vmem_limit_bytes=VMEM_LIMIT),
        cost_estimate=pl.CostEstimate(flops=flops, transcendentals=trans,
                                      bytes_accessed=bytes_acc),
    )(x, kp["w1"], kp["w23"], kp["wh"], kp["wout"], kp["vecs"])


# ---------------------------------------------------------------------------
# Throughput path (B > 256): batch tiled over a parallel grid.  Whole-batch BN
# stats are computed between calls and folded into (2, 256) scale/shift rows.
# ---------------------------------------------------------------------------
def _lin_kernel(x_ref, w_ref, b_ref, out_ref):
    out_ref[...] = _mm(x_ref[...], w_ref[...]) + b_ref[...]


def _bn_swish_lin_kernel(h_ref, ss_ref, w_ref, b_ref, out_ref):
    hn = h_ref[...] * ss_ref[0:1, :] + ss_ref[1:2, :]
    out_ref[...] = _mm(_swish(hn), w_ref[...]) + b_ref[...]


def _bn_swish_heads_kernel(h_ref, ss_ref, wh_ref, wout_ref, hvec_ref, out_ref,
                           *, out_pad):
    hn = h_ref[...] * ss_ref[0:1, :] + ss_ref[1:2, :]
    hc = _swish(_mm(_swish(hn), wh_ref[...]) + hvec_ref[0:1, :])   # (tile, 512)
    out_ref[...] = _mm(hc, wout_ref[...]) + hvec_ref[1:2, :out_pad]


def _bn_scale_shift(lin_out, gamma, beta, n_valid):
    h = lin_out[:n_valid]                                     # exclude pad rows
    mean = jnp.mean(h, axis=0, keepdims=True)
    var = jnp.mean((h - mean) ** 2, axis=0, keepdims=True)    # biased, as BN
    scale = gamma * jax.lax.rsqrt(var + BN_EPS)
    shift = beta - mean * scale
    return jnp.concatenate([scale, shift], axis=0)            # (2, HIDDEN) f32


def _tiled_call(x, kp, out_pad, n_valid):
    B, in_pad = x.shape
    b_pad = ((B + TILE_B - 1) // TILE_B) * TILE_B
    if b_pad != B:
        x = jnp.pad(x, ((0, b_pad - B), (0, 0)))
    grid = (b_pad // TILE_B,)
    cparams = pltpu.CompilerParams(dimension_semantics=("parallel",),
                                   vmem_limit_bytes=VMEM_LIMIT)

    def tile_spec(lanes):
        return pl.BlockSpec((TILE_B, lanes), lambda i: (i, 0))

    def const_spec(a):
        return pl.BlockSpec(a.shape, lambda i: (0, 0))        # VMEM-resident

    def cost(flops, trans, bytes_acc):
        return pl.CostEstimate(flops=flops, transcendentals=trans,
                               bytes_accessed=bytes_acc)

    h_shape = jax.ShapeDtypeStruct((b_pad, HIDDEN), jnp.float32)

    # layer 1: Linear only (its output stats are needed before BN can run).
    l1 = pl.pallas_call(
        _lin_kernel, grid=grid,
        in_specs=[tile_spec(in_pad), const_spec(kp["w1"]), const_spec(kp["b1"])],
        out_specs=tile_spec(HIDDEN), out_shape=h_shape,
        compiler_params=cparams,
        cost_estimate=cost(2 * b_pad * in_pad * HIDDEN, 0,
                           4 * b_pad * in_pad + 2 * kp["w1"].size
                           + 4 * HIDDEN + 4 * b_pad * HIDDEN),
    )(x, kp["w1"], kp["b1"])
    ss1 = _bn_scale_shift(l1, kp["g1"], kp["be1"], n_valid)

    def bn_lin(l_prev, ss, w, b):
        return pl.pallas_call(
            _bn_swish_lin_kernel, grid=grid,
            in_specs=[tile_spec(HIDDEN), const_spec(ss),
                      const_spec(w), const_spec(b)],
            out_specs=tile_spec(HIDDEN), out_shape=h_shape,
            compiler_params=cparams,
            cost_estimate=cost(2 * b_pad * HIDDEN * HIDDEN, b_pad * HIDDEN,
                               8 * b_pad * HIDDEN + 2 * w.size + 12 * HIDDEN),
        )(l_prev, ss, w, b)

    l2 = bn_lin(l1, ss1, kp["w2"], kp["b2"])
    ss2 = _bn_scale_shift(l2, kp["g2"], kp["be2"], n_valid)
    l3 = bn_lin(l2, ss2, kp["w3"], kp["b3"])
    ss3 = _bn_scale_shift(l3, kp["g3"], kp["be3"], n_valid)

    out = pl.pallas_call(
        functools.partial(_bn_swish_heads_kernel, out_pad=out_pad), grid=grid,
        in_specs=[tile_spec(HIDDEN), const_spec(ss3), const_spec(kp["wh"]),
                  const_spec(kp["wout"]), const_spec(kp["hvec"])],
        out_specs=tile_spec(out_pad),
        out_shape=jax.ShapeDtypeStruct((b_pad, out_pad), jnp.float32),
        compiler_params=cparams,
        cost_estimate=cost(
            2 * b_pad * (HIDDEN * 2 * HIDDEN + 2 * HIDDEN * out_pad),
            b_pad * 3 * HIDDEN,
            4 * b_pad * (HIDDEN + out_pad)
            + 2 * (kp["wh"].size + kp["wout"].size) + 4 * kp["hvec"].size),
    )(l3, ss3, kp["wh"], kp["wout"], kp["hvec"])
    return out


# ---------------------------------------------------------------------------
# Top-level forward + parameter packing.
# ---------------------------------------------------------------------------
@functools.partial(jax.jit, static_argnames=("output_size",))
def mlp_actor_critic_forward(x, kparams, *, output_size):
    """x: (B, input_size) f32.  Returns (policy (B, output_size), value (B, 1))."""
    B = x.shape[0]
    in_pad = kparams["w1"].shape[0]
    out_pad = kparams["wout"].shape[1]
    if x.shape[1] != in_pad:                       # lane-pad features to 128n
        x = jnp.pad(x, ((0, 0), (0, in_pad - x.shape[1])))
    if B <= FUSED_MAX_B:
        out = _fused_call(x, kparams, out_pad)     # latency path, 1 call
    else:
        out = _tiled_call(x, kparams, out_pad, B)  # throughput path, 4 gridded calls
    policy = out[:B, :output_size]
    value = out[:B, output_size:output_size + 1]
    return policy, value


def init_params(key, input_size, output_size):
    """Deterministic init matching PyTorch defaults (logical f32 params)."""
    def linear(key, fan_in, fan_out):
        kw, kb = jax.random.split(key)
        bound = 1.0 / (fan_in ** 0.5)
        w = jax.random.uniform(kw, (fan_in, fan_out), jnp.float32, -bound, bound)
        b = jax.random.uniform(kb, (1, fan_out), jnp.float32, -bound, bound)
        return w, b

    def bn(features):
        return (jnp.ones((1, features), jnp.float32),
                jnp.zeros((1, features), jnp.float32))

    keys = jax.random.split(key, 9)
    w1, b1 = linear(keys[0], input_size, HIDDEN)
    g1, be1 = bn(HIDDEN)
    w2, b2 = linear(keys[1], HIDDEN, HIDDEN)
    g2, be2 = bn(HIDDEN)
    w3, b3 = linear(keys[2], HIDDEN, HIDDEN)
    g3, be3 = bn(HIDDEN)
    wa1, ba1 = linear(keys[3], HIDDEN, HIDDEN)       # outputs dead in forward()
    wa2, ba2 = linear(keys[4], HIDDEN, HIDDEN)
    wa, ba = linear(keys[5], HIDDEN, output_size)
    wc1, bc1 = linear(keys[6], HIDDEN, HIDDEN)       # outputs dead in forward()
    wc2, bc2 = linear(keys[7], HIDDEN, HIDDEN)
    wc, bc = linear(keys[8], HIDDEN, 1)

    return (w1, b1, g1, be1,
            w2, b2, g2, be2,
            w3, b3, g3, be3,
            wa1, ba1, wa2, ba2, wa, ba,
            wc1, bc1, wc2, bc2, wc, bc)


def pack_params(params, input_size, output_size):
    """Pack logical params into the kernel layout (bf16 weights, fused heads,
    block-diagonal lane-dense output weight, packed f32 per-feature rows)."""
    (w1, b1, g1, be1,
     w2, b2, g2, be2,
     w3, b3, g3, be3,
     wa1, ba1, wa2, ba2, wa, ba,
     wc1, bc1, wc2, bc2, wc, bc) = params
    del wa1, ba1, wc1, bc1     # actor_1 / critic_1 outputs are dead in forward()

    in_pad = ((input_size + 127) // 128) * 128
    out_pad = ((output_size + 1 + 127) // 128) * 128
    assert out_pad <= 2 * HIDDEN, "output_size + 1 must fit in 512 lanes"

    bf16 = lambda a: a.astype(jnp.bfloat16)

    w1p = jnp.zeros((in_pad, HIDDEN), jnp.float32).at[:input_size].set(w1)

    # fused [actor_2 | critic_2] head (both act on the trunk output).
    wh = jnp.concatenate([wa2, wc2], axis=1)                    # (256, 512)
    bh = jnp.concatenate([ba2, bc2], axis=1)                    # (1, 512)

    # block-diagonal lane-dense output projection.
    wout = jnp.zeros((2 * HIDDEN, out_pad), jnp.float32)
    wout = wout.at[:HIDDEN, :output_size].set(wa)
    wout = wout.at[HIDDEN:, output_size].set(wc[:, 0])
    bout = jnp.zeros((1, out_pad), jnp.float32)
    bout = bout.at[0, :output_size].set(ba[0])
    bout = bout.at[0, output_size].set(bc[0, 0])

    # packed per-feature rows for the fused single-call kernel.
    def wide(v):
        return jnp.zeros((1, 2 * HIDDEN), jnp.float32).at[:, :v.shape[1]].set(v)

    rows = [b1, g1, be1, b2, g2, be2, b3, g3, be3, bh, bout]
    vecs = jnp.zeros((VEC_ROWS, 2 * HIDDEN), jnp.float32)
    vecs = vecs.at[:len(rows)].set(jnp.concatenate([wide(r) for r in rows], axis=0))

    # head biases for the tiled path.
    hvec = jnp.concatenate([bh, wide(bout)], axis=0)            # (2, 512)

    return dict(
        w1=bf16(w1p),
        w2=bf16(w2), w3=bf16(w3),
        w23=bf16(jnp.concatenate([w2, w3], axis=0)),            # stacked (fused path)
        wh=bf16(wh), wout=bf16(wout),
        vecs=vecs, hvec=hvec,
        b1=b1, b2=b2, b3=b3,
        g1=g1, be1=be1, g2=g2, be2=be2, g3=g3, be3=be3,
    )


def reference_forward(x, params, matmul_dtype=jnp.float32):
    """Pure-JAX reference mirroring the PyTorch forward (training-mode BN).
    matmul_dtype=jnp.bfloat16 reproduces the kernel's MXU quantization."""
    (w1, b1, g1, be1,
     w2, b2, g2, be2,
     w3, b3, g3, be3,
     wa1, ba1, wa2, ba2, wa, ba,
     wc1, bc1, wc2, bc2, wc, bc) = params
    del wa1, ba1, wc1, bc1     # dead in the module's forward

    def lin(h, w, b):
        return jnp.dot(h.astype(matmul_dtype), w.astype(matmul_dtype),
                       preferred_element_type=jnp.float32) + b

    def bn(h, g, b):
        mean = jnp.mean(h, axis=0, keepdims=True)
        var = jnp.mean((h - mean) ** 2, axis=0, keepdims=True)
        return (h - mean) * jax.lax.rsqrt(var + BN_EPS) * g + b

    def sw(h):
        return h * jax.nn.sigmoid(h)

    h = sw(bn(lin(x, w1, b1), g1, be1))
    h = sw(bn(lin(h, w2, b2), g2, be2))
    h = sw(bn(lin(h, w3, b3), g3, be3))
    policy = lin(sw(lin(h, wa2, ba2)), wa, ba)     # actor_2 acts on trunk output
    value = lin(sw(lin(h, wc2, bc2)), wc, bc)      # critic_2 acts on trunk output
    return policy, value


if __name__ == "__main__":
    INPUT_SIZE = 32
    OUTPUT_SIZE = 8

    key = jax.random.PRNGKey(0)
    kx, kp_key = jax.random.split(key)
    params = init_params(kp_key, INPUT_SIZE, OUTPUT_SIZE)
    kparams = pack_params(params, INPUT_SIZE, OUTPUT_SIZE)

    # batch=8 exercises the fused single-call latency path; batch=640 the tiled
    # throughput path (grid of 3 x 256-row tiles, zero-padded to 768 rows).
    for batch in (8, 640):
        x = jax.random.normal(jax.random.fold_in(kx, batch),
                              (batch, INPUT_SIZE), jnp.float32)
        policy, value = jax.block_until_ready(
            mlp_actor_critic_forward(x, kparams, output_size=OUTPUT_SIZE))
        assert policy.shape == (batch, OUTPUT_SIZE)
        assert value.shape == (batch, 1)

        # tight check vs a reference using the same bf16 MXU quantization ...
        p_bf, v_bf = reference_forward(x, params, matmul_dtype=jnp.bfloat16)
        assert jnp.allclose(policy, p_bf, atol=1e-2, rtol=1e-2)
        assert jnp.allclose(value, v_bf, atol=1e-2, rtol=1e-2)
        # ... and a looser check vs the true f32 module to bound bf16 drift.
        p_f32, v_f32 = reference_forward(x, params, matmul_dtype=jnp.float32)
        assert jnp.allclose(policy, p_f32, atol=5e-2, rtol=5e-2)
        assert jnp.allclose(value, v_f32, atol=5e-2, rtol=5e-2)

    print("KERNEL_OK")
</pallas_src>

<mosaic_0001>
module attributes {stable_mosaic.version = 11 : i64} {
  func.func @_fused_kernel(%arg0: memref<8x128xf32, #tpu.memory_space<vmem>>, %arg1: memref<128x256xbf16, #tpu.memory_space<vmem>>, %arg2: memref<512x256xbf16, #tpu.memory_space<vmem>>, %arg3: memref<256x512xbf16, #tpu.memory_space<vmem>>, %arg4: memref<512x128xbf16, #tpu.memory_space<vmem>>, %arg5: memref<16x512xf32, #tpu.memory_space<vmem>>, %arg6: memref<8x128xf32, #tpu.memory_space<vmem>>) attributes {dimension_semantics = [], scalar_prefetch = 0 : i64, scratch_operands = 0 : i64, tpu.core_type = #tpu.core_type<tc>} {
    %c0 = arith.constant 0 : index
    %c0_0 = arith.constant 0 : index
    %0 = vector.load %arg0[%c0, %c0_0] : memref<8x128xf32, #tpu.memory_space<vmem>>, vector<8x128xf32>
    %c0_1 = arith.constant 0 : index
    %c0_2 = arith.constant 0 : index
    %1 = vector.load %arg5[%c0_1, %c0_2] : memref<16x512xf32, #tpu.memory_space<vmem>>, vector<16x512xf32>
    %c0_3 = arith.constant 0 : index
    %c0_4 = arith.constant 0 : index
    %2 = vector.load %arg1[%c0_3, %c0_4] : memref<128x256xbf16, #tpu.memory_space<vmem>>, vector<128x256xbf16>
    %3 = arith.truncf %0 : vector<8x128xf32> to vector<8x128xbf16>
    %cst = arith.constant dense<0.000000e+00> : vector<8x256xf32>
    %4 = tpu.matmul %3, %2, %cst {dimension_numbers = #tpu.dot_dimension_numbers<[1], [0], [0], [1], [0, 0, 1, 1], [], []>} : vector<8x128xbf16>, vector<128x256xbf16>, vector<8x256xf32> -> vector<8x256xf32>
    %5 = vector.extract_strided_slice %1 {offsets = [0, 0], sizes = [1, 256], strides = [1, 1]} : vector<16x512xf32> to vector<1x256xf32>
    %6 = vector.broadcast %5 : vector<1x256xf32> to vector<8x256xf32>
    %7 = arith.addf %4, %6 : vector<8x256xf32>
    %cst_5 = arith.constant dense<0.000000e+00> : vector<256xf32>
    %8 = vector.multi_reduction <add>, %7, %cst_5 [0] : vector<8x256xf32> to vector<256xf32>
    %9 = vector.shape_cast %8 : vector<256xf32> to vector<1x256xf32>
    %cst_6 = arith.constant 8.000000e+00 : f32
    %10 = vector.broadcast %cst_6 : f32 to vector<1x256xf32>
    %11 = arith.divf %9, %10 : vector<1x256xf32>
    %12 = arith.mulf %7, %7 : vector<8x256xf32>
    %cst_7 = arith.constant dense<0.000000e+00> : vector<256xf32>
    %13 = vector.multi_reduction <add>, %12, %cst_7 [0] : vector<8x256xf32> to vector<256xf32>
    %14 = vector.shape_cast %13 : vector<256xf32> to vector<1x256xf32>
    %cst_8 = arith.constant 8.000000e+00 : f32
    %15 = vector.broadcast %cst_8 : f32 to vector<1x256xf32>
    %16 = arith.divf %14, %15 : vector<1x256xf32>
    %17 = arith.mulf %11, %11 : vector<1x256xf32>
    %18 = arith.subf %16, %17 : vector<1x256xf32>
    %cst_9 = arith.constant 0.000000e+00 : f32
    %19 = vector.broadcast %cst_9 : f32 to vector<1x256xf32>
    %20 = arith.maximumf %18, %19 : vector<1x256xf32>
    %21 = vector.extract_strided_slice %1 {offsets = [1, 0], sizes = [1, 256], strides = [1, 1]} : vector<16x512xf32> to vector<1x256xf32>
    %cst_10 = arith.constant 9.99999974E-6 : f32
    %22 = vector.broadcast %cst_10 : f32 to vector<1x256xf32>
    %23 = arith.addf %20, %22 : vector<1x256xf32>
    %24 = math.rsqrt %23 : vector<1x256xf32>
    %25 = arith.mulf %21, %24 : vector<1x256xf32>
    %26 = vector.extract_strided_slice %1 {offsets = [2, 0], sizes = [1, 256], strides = [1, 1]} : vector<16x512xf32> to vector<1x256xf32>
    %27 = arith.mulf %11, %25 : vector<1x256xf32>
    %28 = arith.subf %26, %27 : vector<1x256xf32>
    %29 = vector.broadcast %25 : vector<1x256xf32> to vector<8x256xf32>
    %30 = arith.mulf %7, %29 : vector<8x256xf32>
    %31 = vector.broadcast %28 : vector<1x256xf32> to vector<8x256xf32>
    %32 = arith.addf %30, %31 : vector<8x256xf32>
    %33 = arith.negf %32 : vector<8x256xf32>
    %34 = math.exp %33 : vector<8x256xf32>
    %cst_11 = arith.constant 1.000000e+00 : f32
    %35 = vector.broadcast %cst_11 : f32 to vector<8x256xf32>
    %36 = arith.addf %35, %34 : vector<8x256xf32>
    %37 = arith.divf %35, %36 : vector<8x256xf32>
    %38 = arith.mulf %32, %37 : vector<8x256xf32>
    %c0_12 = arith.constant 0 : index
    %c0_13 = arith.constant 0 : index
    %39 = vector.load %arg2[%c0_12, %c0_13] : memref<512x256xbf16, #tpu.memory_space<vmem>>, vector<256x256xbf16>
    %40 = arith.truncf %38 : vector<8x256xf32> to vector<8x256xbf16>
    %cst_14 = arith.constant dense<0.000000e+00> : vector<8x256xf32>
    %41 = tpu.matmul %40, %39, %cst_14 {dimension_numbers = #tpu.dot_dimension_numbers<[1], [0], [0], [1], [0, 0, 1, 1], [], []>} : vector<8x256xbf16>, vector<256x256xbf16>, vector<8x256xf32> -> vector<8x256xf32>
    %42 = vector.extract_strided_slice %1 {offsets = [3, 0], sizes = [1, 256], strides = [1, 1]} : vector<16x512xf32> to vector<1x256xf32>
    %43 = vector.broadcast %42 : vector<1x256xf32> to vector<8x256xf32>
    %44 = arith.addf %41, %43 : vector<8x256xf32>
    %cst_15 = arith.constant dense<0.000000e+00> : vector<256xf32>
    %45 = vector.multi_reduction <add>, %44, %cst_15 [0] : vector<8x256xf32> to vector<256xf32>
    %46 = vector.shape_cast %45 : vector<256xf32> to vector<1x256xf32>
    %cst_16 = arith.constant 8.000000e+00 : f32
    %47 = vector.broadcast %cst_16 : f32 to vector<1x256xf32>
    %48 = arith.divf %46, %47 : vector<1x256xf32>
    %49 = arith.mulf %44, %44 : vector<8x256xf32>
    %cst_17 = arith.constant dense<0.000000e+00> : vector<256xf32>
    %50 = vector.multi_reduction <add>, %49, %cst_17 [0] : vector<8x256xf32> to vector<256xf32>
    %51 = vector.shape_cast %50 : vector<256xf32> to vector<1x256xf32>
    %cst_18 = arith.constant 8.000000e+00 : f32
    %52 = vector.broadcast %cst_18 : f32 to vector<1x256xf32>
    %53 = arith.divf %51, %52 : vector<1x256xf32>
    %54 = arith.mulf %48, %48 : vector<1x256xf32>
    %55 = arith.subf %53, %54 : vector<1x256xf32>
    %cst_19 = arith.constant 0.000000e+00 : f32
    %56 = vector.broadcast %cst_19 : f32 to vector<1x256xf32>
    %57 = arith.maximumf %55, %56 : vector<1x256xf32>
    %58 = vector.extract_strided_slice %1 {offsets = [4, 0], sizes = [1, 256], strides = [1, 1]} : vector<16x512xf32> to vector<1x256xf32>
    %cst_20 = arith.constant 9.99999974E-6 : f32
    %59 = vector.broadcast %cst_20 : f32 to vector<1x256xf32>
    %60 = arith.addf %57, %59 : vector<1x256xf32>
    %61 = math.rsqrt %60 : vector<1x256xf32>
    %62 = arith.mulf %58, %61 : vector<1x256xf32>
    %63 = vector.extract_strided_slice %1 {offsets = [5, 0], sizes = [1, 256], strides = [1, 1]} : vector<16x512xf32> to vector<1x256xf32>
    %64 = arith.mulf %48, %62 : vector<1x256xf32>
    %65 = arith.subf %63, %64 : vector<1x256xf32>
    %66 = vector.broadcast %62 : vector<1x256xf32> to vector<8x256xf32>
    %67 = arith.mulf %44, %66 : vector<8x256xf32>
    %68 = vector.broadcast %65 : vector<1x256xf32> to vector<8x256xf32>
    %69 = arith.addf %67, %68 : vector<8x256xf32>
    %70 = arith.negf %69 : vector<8x256xf32>
    %71 = math.exp %70 : vector<8x256xf32>
    %cst_21 = arith.constant 1.000000e+00 : f32
    %72 = vector.broadcast %cst_21 : f32 to vector<8x256xf32>
    %73 = arith.addf %72, %71 : vector<8x256xf32>
    %74 = arith.divf %72, %73 : vector<8x256xf32>
    %75 = arith.mulf %69, %74 : vector<8x256xf32>
    %c256 = arith.constant 256 : index
    %c0_22 = arith.constant 0 : index
    %76 = vector.load %arg2[%c256, %c0_22] : memref<512x256xbf16, #tpu.memory_space<vmem>>, vector<256x256xbf16>
    %77 = arith.truncf %75 : vector<8x256xf32> to vector<8x256xbf16>
    %cst_23 = arith.constant dense<0.000000e+00> : vector<8x256xf32>
    %78 = tpu.matmul %77, %76, %cst_23 {dimension_numbers = #tpu.dot_dimension_numbers<[1], [0], [0], [1], [0, 0, 1, 1], [], []>} : vector<8x256xbf16>, vector<256x256xbf16>, vector<8x256xf32> -> vector<8x256xf32>
    %79 = vector.extract_strided_slice %1 {offsets = [6, 0], sizes = [1, 256], strides = [1, 1]} : vector<16x512xf32> to vector<1x256xf32>
    %80 = vector.broadcast %79 : vector<1x256xf32> to vector<8x256xf32>
    %81 = arith.addf %78, %80 : vector<8x256xf32>
    %cst_24 = arith.constant dense<0.000000e+00> : vector<256xf32>
    %82 = vector.multi_reduction <add>, %81, %cst_24 [0] : vector<8x256xf32> to vector<256xf32>
    %83 = vector.shape_cast %82 : vector<256xf32> to vector<1x256xf32>
    %cst_25 = arith.constant 8.000000e+00 : f32
    %84 = vector.broadcast %cst_25 : f32 to vector<1x256xf32>
    %85 = arith.divf %83, %84 : vector<1x256xf32>
    %86 = arith.mulf %81, %81 : vector<8x256xf32>
    %cst_26 = arith.constant dense<0.000000e+00> : vector<256xf32>
    %87 = vector.multi_reduction <add>, %86, %cst_26 [0] : vector<8x256xf32> to vector<256xf32>
    %88 = vector.shape_cast %87 : vector<256xf32> to vector<1x256xf32>
    %cst_27 = arith.constant 8.000000e+00 : f32
    %89 = vector.broadcast %cst_27 : f32 to vector<1x256xf32>
    %90 = arith.divf %88, %89 : vector<1x256xf32>
    %91 = arith.mulf %85, %85 : vector<1x256xf32>
    %92 = arith.subf %90, %91 : vector<1x256xf32>
    %cst_28 = arith.constant 0.000000e+00 : f32
    %93 = vector.broadcast %cst_28 : f32 to vector<1x256xf32>
    %94 = arith.maximumf %92, %93 : vector<1x256xf32>
    %95 = vector.extract_strided_slice %1 {offsets = [7, 0], sizes = [1, 256], strides = [1, 1]} : vector<16x512xf32> to vector<1x256xf32>
    %cst_29 = arith.constant 9.99999974E-6 : f32
    %96 = vector.broadcast %cst_29 : f32 to vector<1x256xf32>
    %97 = arith.addf %94, %96 : vector<1x256xf32>
    %98 = math.rsqrt %97 : vector<1x256xf32>
    %99 = arith.mulf %95, %98 : vector<1x256xf32>
    %100 = vector.extract_strided_slice %1 {offsets = [8, 0], sizes = [1, 256], strides = [1, 1]} : vector<16x512xf32> to vector<1x256xf32>
    %101 = arith.mulf %85, %99 : vector<1x256xf32>
    %102 = arith.subf %100, %101 : vector<1x256xf32>
    %103 = vector.broadcast %99 : vector<1x256xf32> to vector<8x256xf32>
    %104 = arith.mulf %81, %103 : vector<8x256xf32>
    %105 = vector.broadcast %102 : vector<1x256xf32> to vector<8x256xf32>
    %106 = arith.addf %104, %105 : vector<8x256xf32>
    %107 = arith.negf %106 : vector<8x256xf32>
    %108 = math.exp %107 : vector<8x256xf32>
    %cst_30 = arith.constant 1.000000e+00 : f32
    %109 = vector.broadcast %cst_30 : f32 to vector<8x256xf32>
    %110 = arith.addf %109, %108 : vector<8x256xf32>
    %111 = arith.divf %109, %110 : vector<8x256xf32>
    %112 = arith.mulf %106, %111 : vector<8x256xf32>
    %c0_31 = arith.constant 0 : index
    %c0_32 = arith.constant 0 : index
    %113 = vector.load %arg3[%c0_31, %c0_32] : memref<256x512xbf16, #tpu.memory_space<vmem>>, vector<256x512xbf16>
    %114 = arith.truncf %112 : vector<8x256xf32> to vector<8x256xbf16>
    %cst_33 = arith.constant dense<0.000000e+00> : vector<8x512xf32>
    %115 = tpu.matmul %114, %113, %cst_33 {dimension_numbers = #tpu.dot_dimension_numbers<[1], [0], [0], [1], [0, 0, 1, 1], [], []>} : vector<8x256xbf16>, vector<256x512xbf16>, vector<8x512xf32> -> vector<8x512xf32>
    %116 = vector.extract_strided_slice %1 {offsets = [9, 0], sizes = [1, 512], strides = [1, 1]} : vector<16x512xf32> to vector<1x512xf32>
    %117 = vector.broadcast %116 : vector<1x512xf32> to vector<8x512xf32>
    %118 = arith.addf %115, %117 : vector<8x512xf32>
    %119 = arith.negf %118 : vector<8x512xf32>
    %120 = math.exp %119 : vector<8x512xf32>
    %cst_34 = arith.constant 1.000000e+00 : f32
    %121 = vector.broadcast %cst_34 : f32 to vector<8x512xf32>
    %122 = arith.addf %121, %120 : vector<8x512xf32>
    %123 = arith.divf %121, %122 : vector<8x512xf32>
    %124 = arith.mulf %118, %123 : vector<8x512xf32>
    %c0_35 = arith.constant 0 : index
    %c0_36 = arith.constant 0 : index
    %125 = vector.load %arg4[%c0_35, %c0_36] : memref<512x128xbf16, #tpu.memory_space<vmem>>, vector<512x128xbf16>
    %126 = arith.truncf %124 : vector<8x512xf32> to vector<8x512xbf16>
    %cst_37 = arith.constant dense<0.000000e+00> : vector<8x128xf32>
    %127 = tpu.matmul %126, %125, %cst_37 {dimension_numbers = #tpu.dot_dimension_numbers<[1], [0], [0], [1], [0, 0, 1, 1], [], []>} : vector<8x512xbf16>, vector<512x128xbf16>, vector<8x128xf32> -> vector<8x128xf32>
    %128 = vector.extract_strided_slice %1 {offsets = [10, 0], sizes = [1, 128], strides = [1, 1]} : vector<16x512xf32> to vector<1x128xf32>
    %129 = vector.broadcast %128 : vector<1x128xf32> to vector<8x128xf32>
    %130 = arith.addf %127, %129 : vector<8x128xf32>
    %c0_38 = arith.constant 0 : index
    %c0_39 = arith.constant 0 : index
    %131 = vector.load %arg6[%c0_38, %c0_39] : memref<8x128xf32, #tpu.memory_space<vmem>>, vector<8x128xf32>
    tpu.vector_store %arg6[%c0_38, %c0_39], %130 {strides = array<i32>} : memref<8x128xf32, #tpu.memory_space<vmem>>, vector<8x128xf32>,
    return
  }
}

</mosaic_0001>

<bundles_post_ra>
// kernel: mlp_actor_critic_forward.1
= control target key start
LH: loop header
LB: loop body
LE: loop exit
PB: predicated region body
PF: predicated region fallthrough
CT: control target
= control target key end

     0   :  { %11 = vsyncpa [#allocation3], 0  ;;  %s3301_s0 = inlined_call_operand.vmem [shape: f32[8,128], index: 0, kind: input, shape index: {}]   ;;  %s3302_s1 = inlined_call_operand.hbm [shape: bf16[128,256], index: 1, kind: input, shape index: {}]   ;;  %s3303_s2 = inlined_call_operand.hbm [shape: bf16[512,256], index: 2, kind: input, shape index: {}]   ;;  %s3304_s3 = inlined_call_operand.hbm [shape: bf16[256,512], index: 3, kind: input, shape index: {}]   ;;  %s3305_s4 = inlined_call_operand.hbm [shape: bf16[512,128], index: 4, kind: input, shape index: {}]   ;;  %s3306_s5 = inlined_call_operand.hbm [shape: f32[16,512], index: 5, kind: input, shape index: {}]   ;;  %s3307_s6 = inlined_call_operand.vmem [shape: f32[8,128], index: 6, kind: output, shape index: {}]  }
   0x1   :  { %12 = vsyncpa [#allocation5], 0 }
   0x2   :  { %13 = vsyncpa [#allocation8], 0  ;;  %s33_s23 = sshll.u32 %s3303_s2, 4  ;;  %s3071_s24 = smov [#allocation4]   ;;  %s34_s23 = int_to_ptr.hbm [resolvable:$true] %s33_s23 }
   0x3   :  { %s35_s25 = sshll.u32 %s3071_s24, 4  ;;  %s59_s28 = sshll.u32 %s3305_s4, 4  ;;  %s36_s25 = int_to_ptr.vmem [resolvable:$true] %s35_s25  ;;  %s60_s28 = int_to_ptr.hbm [resolvable:$true] %s59_s28 }
   0x4   :  { %s3072_s29 = smov 128   ;;  %s3073_s30 = smov 8  }
   0x5   :  { %41 = dma.hbm_to_vmem [thread:$0]  %s34_s23, 8192, %s36_s25, [#allocation5], %s3072_s29, %s3072_s29, %s3073_s30  }
   0x6   :  { %s3074_s7 = smov [#allocation7]   ;;  %s3075_s9 = smov 64  }
   0x7   :  { %s61_s8 = sshll.u32 %s3074_s7, 4  ;;  %s3076_s10 = smov 4   ;;  %s62_s8 = int_to_ptr.vmem [resolvable:$true] %s61_s8 }
   0x8   :  { %67 = dma.hbm_to_vmem [thread:$0]  %s60_s28, 4096, %s62_s8, [#allocation8], %s3075_s9, %s3075_s9, %s3076_s10  }
   0x9   :  { %s20_s12 = sshll.u32 %s3302_s1, 4  ;;  %s3077_s13 = smov [#allocation2]   ;;  %s21_s12 = int_to_ptr.hbm [resolvable:$true] %s20_s12 }
   0xa   :  { %s22_s14 = sshll.u32 %s3077_s13, 4  ;;  %s46_s16 = sshll.u32 %s3304_s3, 4  ;;  %s23_s14 = int_to_ptr.vmem [resolvable:$true] %s22_s14  ;;  %s47_s16 = int_to_ptr.hbm [resolvable:$true] %s46_s16 }
   0xb   :  { %28 = dma.hbm_to_vmem [thread:$0]  %s21_s12, 2048, %s23_s14, [#allocation3], %s3072_s29, %s3072_s29, %s3073_s30  }
   0xc   :  { %s3078_s17 = smov [#allocation6]   ;;  %s3079_s19 = smov 256  }
   0xd   :  { %s48_s18 = sshll.u32 %s3078_s17, 4  ;;  %s3080_s20 = smov 16   ;;  %s49_s18 = int_to_ptr.vmem [resolvable:$true] %s48_s18 }
   0xe   :  { %54 = dma.hbm_to_vmem [thread:$0]  %s47_s16, 8192, %s49_s18, [#allocation5], %s3079_s19, %s3079_s19, %s3080_s20  }
   0xf   :  { %s72_s1 = sshll.u32 %s3306_s5, 4  ;;  %s3081_s23 = smov [#allocation9]   ;;  %s73_s1 = int_to_ptr.hbm [resolvable:$true] %s72_s1 }
  0x10   :  { %s74_s24 = sshll.u32 %s3081_s23, 4  ;;  %s3082_s25 = smov 512   ;;  %s75_s24 = int_to_ptr.vmem [resolvable:$true] %s74_s24 }
  0x11   :  { %s3083_s26 = smov 32  }
  0x12   :  { %80 = dma.hbm_to_vmem [thread:$0]  %s73_s1, 1024, %s75_s24, [#allocation8], %s3082_s25, %s3082_s25, %s3083_s26  }
  0x13   :  { %3065 = dma.done.wait [#allocation3], 2048  }
  0x14   :  { %3066 = vsyncadd [#allocation3], 4294965248 }
  0x15   :  { %3067 = dma.done.wait [#allocation5], 16384  }
  0x16   :  { %3068 = vsyncadd [#allocation5], 4294950912 }
  0x17   :  { %3069 = dma.done.wait [#allocation8], 5120  }
  0x18   :  { %3070 = vsyncadd [#allocation8], 4294962176  ;;  %v2043_v0 = vld [vmem:[#allocation2 + $0x70] sm:$0xf]  ;;  %v2714_v1 = vld [vmem:[#allocation2 + $0x74] sm:$0xf0] }
  0x19   :  { %v2713_v2 = vld [vmem:[#allocation2 + $0x74] sm:$0xf]  ;;  %v2044_v3 = vor.u32 %v2714_v1, %v2043_v0  ;;  %v2045_v4 = vld [vmem:[#allocation2 + $0x78] sm:$0xf0]  ;;  %v2035_v5 = vld [vmem:[#allocation2 + $0x60] sm:$0xf] }
  0x1a   :  { %v2712_v6 = vld [vmem:[#allocation2 + $0x64] sm:$0xf0]  ;;  %v2048_v7 = vor.u32 %v2713_v2, %v2045_v4  ;;  %v2711_v8 = vld [vmem:[#allocation2 + $0x64] sm:$0xf]  ;;  %v2037_v9 = vld [vmem:[#allocation2 + $0x68] sm:$0xf0] }
  0x1b   :  { %207 = vmatpush.bf16.msra.mxu0 %v2044_v3  ;;  %v2036_v10 = vor.u32 %v2712_v6, %v2035_v5  ;;  %v2040_v11 = vor.u32 %v2711_v8, %v2037_v9  ;;  %v2027_v12 = vld [vmem:[#allocation2 + $0x50] sm:$0xf]  ;;  %v2710_v13 = vld [vmem:[#allocation2 + $0x54] sm:$0xf0]  ;;  %v2709_v14 = vld [vmem:[#allocation2 + $0x54] sm:$0xf] }
  0x1c   :  { %220 = vmatpush.bf16.msra.mxu1 %v2048_v7  ;;  %v2029_v15 = vld [vmem:[#allocation2 + $0x58] sm:$0xf0]  ;;  %v2028_v16 = vor.u32 %v2710_v13, %v2027_v12  ;;  %v2019_v18 = vld [vmem:[#allocation2 + $0x40] sm:$0xf]  ;;  %v2708_v19 = vld [vmem:[#allocation2 + $0x44] sm:$0xf0] }
  0x1d   :  { %v2032_v17 = vor.u32 %v2709_v14, %v2029_v15  ;;  %v2707_v20 = vld [vmem:[#allocation2 + $0x44] sm:$0xf]  ;;  %v2021_v21 = vld [vmem:[#allocation2 + $0x48] sm:$0xf0]  ;;  %v2020_v22 = vor.u32 %v2708_v19, %v2019_v18  ;;  %v2011_v24 = vld [vmem:[#allocation2 + $0x30] sm:$0xf] }
  0x1e   :  { %v2024_v23 = vor.u32 %v2707_v20, %v2021_v21  ;;  %v2706_v25 = vld [vmem:[#allocation2 + $0x34] sm:$0xf0]  ;;  %v2705_v26 = vld [vmem:[#allocation2 + $0x34] sm:$0xf]  ;;  %v2013_v27 = vld [vmem:[#allocation2 + $0x38] sm:$0xf0] }
  0x1f   :  { %208 = vmatpush.bf16.msra.mxu0 %v2036_v10  ;;  %v2012_v28 = vor.u32 %v2706_v25, %v2011_v24  ;;  %v2016_v29 = vor.u32 %v2705_v26, %v2013_v27  ;;  %v2003_v30 = vld [vmem:[#allocation2 + $0x20] sm:$0xf]  ;;  %v2704_v31 = vld [vmem:[#allocation2 + $0x24] sm:$0xf0]  ;;  %v2703_v32 = vld [vmem:[#allocation2 + $0x24] sm:$0xf] }
  0x20   :  { %221 = vmatpush.bf16.msra.mxu1 %v2040_v11  ;;  %v2005_v33 = vld [vmem:[#allocation2 + $0x28] sm:$0xf0]  ;;  %v2004_v34 = vor.u32 %v2704_v31, %v2003_v30  ;;  %v1995_v36 = vld [vmem:[#allocation2 + $0x10] sm:$0xf]  ;;  %v2702_v37 = vld [vmem:[#allocation2 + $0x14] sm:$0xf0] }
  0x21   :  { %v2008_v35 = vor.u32 %v2703_v32, %v2005_v33  ;;  %v2701_v38 = vld [vmem:[#allocation2 + $0x14] sm:$0xf]  ;;  %v1997_v39 = vld [vmem:[#allocation2 + $0x18] sm:$0xf0]  ;;  %v1996_v40 = vor.u32 %v2702_v37, %v1995_v36  ;;  %v1987_v42 = vld [vmem:[#allocation2] sm:$0xf] }
  0x22   :  { %v2000_v41 = vor.u32 %v2701_v38, %v1997_v39  ;;  %v2700_v43 = vld [vmem:[#allocation2 + $0x4] sm:$0xf0]  ;;  %v2699_v44 = vld [vmem:[#allocation2 + $0x4] sm:$0xf]  ;;  %v1989_v45 = vld [vmem:[#allocation2 + $0x8] sm:$0xf0] }
  0x23   :  { %209 = vmatpush.bf16.msra.mxu0 %v2028_v16  ;;  %v1988_v46 = vor.u32 %v2700_v43, %v1987_v42  ;;  %v101_v47 = vld [vmem:[%s3301_s0] sm:$0xff]  ;;  %v1992_v48 = vor.u32 %v2699_v44, %v1989_v45  ;;  %v2109_v50 = vld [vmem:[#allocation4 + $0x70] sm:$0xf]  ;;  %v2730_v51 = vld [vmem:[#allocation4 + $0x74] sm:$0xf0]  ;;  %v3084_v53 = vmov 8.0  }
  0x24   :  { %222 = vmatpush.bf16.msra.mxu1 %v2032_v17  ;;  %v124_v49 = vpack.c.bf16 %v101_v47, %v101_v47  ;;  %v2173_v52 = vld [vmem:[#allocation4 + $0xf0] sm:$0xf]  ;;  %2889 = vrcp.f32 %v3084_v53  ;;  %v2110_v54 = vor.u32 %v2730_v51, %v2109_v50  ;;  %v2746_v55 = vld [vmem:[#allocation4 + $0xf4] sm:$0xf0]  ;;  %v2729_v56 = vld [vmem:[#allocation4 + $0x74] sm:$0xf] }
  0x25   :  { %v2111_v57 = vld [vmem:[#allocation4 + $0x78] sm:$0xf0]  ;;  %v2174_v58 = vor.u32 %v2746_v55, %v2173_v52  ;;  %v2745_v60 = vld [vmem:[#allocation4 + $0xf4] sm:$0xf]  ;;  %v2101_v62 = vld [vmem:[#allocation4 + $0x60] sm:$0xf] }
  0x26   :  { %v2114_v59 = vor.u32 %v2729_v56, %v2111_v57  ;;  %v2175_v61 = vld [vmem:[#allocation4 + $0xf8] sm:$0xf0]  ;;  %554 = vmatpush.bf16.msra.mxu2 %v2110_v54  ;;  %v2728_v0 = vld [vmem:[#allocation4 + $0x64] sm:$0xf0]  ;;  %v2165_v1 = vld [vmem:[#allocation4 + $0xe0] sm:$0xf] }
  0x27   :  { %210 = vmatpush.bf16.msra.mxu0 %v2020_v22  ;;  %v2178_v63 = vor.u32 %v2745_v60, %v2175_v61  ;;  %v2744_v2 = vld [vmem:[#allocation4 + $0xe4] sm:$0xf0]  ;;  %567 = vmatpush.bf16.msra.mxu3 %v2174_v58  ;;  %v2102_v3 = vor.u32 %v2728_v0, %v2101_v62  ;;  %v2727_v5 = vld [vmem:[#allocation4 + $0x64] sm:$0xf]  ;;  %v2103_v6 = vld [vmem:[#allocation4 + $0x68] sm:$0xf0] }
  0x28   :  { %223 = vmatpush.bf16.msra.mxu1 %v2024_v23  ;;  %v2166_v4 = vor.u32 %v2744_v2, %v2165_v1  ;;  %v2743_v7 = vld [vmem:[#allocation4 + $0xe4] sm:$0xf]  ;;  %v2106_v8 = vor.u32 %v2727_v5, %v2103_v6  ;;  %v2167_v9 = vld [vmem:[#allocation4 + $0xe8] sm:$0xf0]  ;;  %v2093_v10 = vld [vmem:[#allocation4 + $0x50] sm:$0xf] }
  0x29   :  { %v2726_v11 = vld [vmem:[#allocation4 + $0x54] sm:$0xf0]  ;;  %v3138_v12 = vld [vmem:[#allocation9] sm:$0xff]  ;;  %v3140_v13 = vld [vmem:[#allocation9 + $0x8] sm:$0xff]  ;;  %v2170_v14 = vor.u32 %v2743_v7, %v2167_v9 }
  0x2a   :  { %v2157_v15 = vld [vmem:[#allocation4 + $0xd0] sm:$0xf]  ;;  %v2742_v16 = vld [vmem:[#allocation4 + $0xd4] sm:$0xf0]  ;;  %v2725_v17 = vld [vmem:[#allocation4 + $0x54] sm:$0xf]  ;;  %v3142_v18 = vpop.eup %2889  ;;  %555 = vmatpush.bf16.msra.mxu2 %v2102_v3  ;;  %v2094_v19 = vor.u32 %v2726_v11, %v2093_v10 }
  0x2b   :  { %211 = vmatpush.bf16.msra.mxu0 %v2012_v28  ;;  %v2095_v20 = vld [vmem:[#allocation4 + $0x58] sm:$0xf0]  ;;  %v2741_v21 = vld [vmem:[#allocation4 + $0xd4] sm:$0xf]  ;;  %568 = vmatpush.bf16.msra.mxu3 %v2166_v4  ;;  %v2158_v23 = vor.u32 %v2742_v16, %v2157_v15  ;;  %v2085_v25 = vld [vmem:[#allocation4 + $0x40] sm:$0xf]  ;;  %vm250_vm0 = vweird.f32 %v3142_v18 }
  0x2c   :  { %224 = vmatpush.bf16.msra.mxu1 %v2016_v29  ;;  %v2159_v22 = vld [vmem:[#allocation4 + $0xd8] sm:$0xf0]  ;;  %v2098_v24 = vor.u32 %v2725_v17, %v2095_v20  ;;  %v2724_v26 = vld [vmem:[#allocation4 + $0x44] sm:$0xf0]  ;;  %v2149_v27 = vld [vmem:[#allocation4 + $0xc0] sm:$0xf] }
  0x2d   :  { %v2162_v28 = vor.u32 %v2741_v21, %v2159_v22  ;;  %v2740_v29 = vld [vmem:[#allocation4 + $0xc4] sm:$0xf0]  ;;  %v2723_v30 = vld [vmem:[#allocation4 + $0x44] sm:$0xf]  ;;  %v2087_v31 = vld [vmem:[#allocation4 + $0x48] sm:$0xf0]  ;;  %v2086_v37 = vor.u32 %v2724_v26, %v2085_v25 }
  0x2e   :  { %v246_v32 = vmul.f32 8.0, %v3142_v18  ;;  %v2739_v33 = vld [vmem:[#allocation4 + $0xc4] sm:$0xf]  ;;  %v126_v36 = vperm.slane %v3140_v13, 0  ;;  %556 = vmatpush.bf16.msra.mxu2 %v2094_v19  ;;  %v2150_v38 = vor.u32 %v2740_v29, %v2149_v27  ;;  %v2090_v39 = vor.u32 %v2723_v30, %v2087_v31  ;;  %v2141_v42 = vld [vmem:[#allocation4 + $0xb0] sm:$0xf] }
  0x2f   :  { %212 = vmatpush.bf16.msra.mxu0 %v2004_v34  ;;  %v2151_v34 = vld [vmem:[#allocation4 + $0xc8] sm:$0xf0]  ;;  %569 = vmatpush.bf16.msra.mxu3 %v2158_v23  ;;  %v2738_v44 = vld [vmem:[#allocation4 + $0xb4] sm:$0xf0]  ;;  %v2721_v45 = vld [vmem:[#allocation4 + $0x34] sm:$0xf] }
  0x30   :  { %225 = vmatpush.bf16.msra.mxu1 %v2008_v35  ;;  %v125_v35 = vperm.slane %v3138_v12, 0  ;;  %v2154_v43 = vor.u32 %v2739_v33, %v2151_v34  ;;  %v2143_v50 = vld [vmem:[#allocation4 + $0xb8] sm:$0xf0]  ;;  %v2069_v54 = vld [vmem:[#allocation4 + $0x20] sm:$0xf]  ;;  %v2142_v56 = vor.u32 %v2738_v44, %v2141_v42 }
  0x31   :  { %v2720_v58 = vld [vmem:[#allocation4 + $0x24] sm:$0xf0]  ;;  %v2719_v0 = vld [vmem:[#allocation4 + $0x24] sm:$0xf]  ;;  %v2071_v1 = vld [vmem:[#allocation4 + $0x28] sm:$0xf0] }
  0x32   :  { %557 = vmatpush.bf16.msra.mxu2 %v2086_v37  ;;  %v2736_v60 = vld [vmem:[#allocation4 + $0xa4] sm:$0xf0]  ;;  %v2735_v5 = vld [vmem:[#allocation4 + $0xa4] sm:$0xf]  ;;  %v2135_v6 = vld [vmem:[#allocation4 + $0xa8] sm:$0xf0]  ;;  %v2070_v9 = vor.u32 %v2720_v58, %v2069_v54  ;;  %v2074_v17 = vor.u32 %v2719_v0, %v2071_v1 }
  0x33   :  { %213 = vmatpush.bf16.msra.mxu0 %v1996_v40  ;;  %v2077_v40 = vld [vmem:[#allocation4 + $0x30] sm:$0xf]  ;;  %570 = vmatpush.bf16.msra.mxu3 %v2150_v38  ;;  %v2718_v11 = vld [vmem:[#allocation4 + $0x14] sm:$0xf0]  ;;  %v2138_v23 = vor.u32 %v2735_v5, %v2135_v6  ;;  %v2063_v25 = vld [vmem:[#allocation4 + $0x18] sm:$0xf0] }
  0x34   :  { %226 = vmatpush.bf16.msra.mxu1 %v2000_v41  ;;  %v2722_v41 = vld [vmem:[#allocation4 + $0x34] sm:$0xf0]  ;;  %v2061_v10 = vld [vmem:[#allocation4 + $0x10] sm:$0xf]  ;;  %v2733_v30 = vld [vmem:[#allocation4 + $0x94] sm:$0xf] }
  0x35   :  { %v2078_v53 = vor.u32 %v2722_v41, %v2077_v40  ;;  %v2125_v19 = vld [vmem:[#allocation4 + $0x90] sm:$0xf]  ;;  %v2734_v20 = vld [vmem:[#allocation4 + $0x94] sm:$0xf0]  ;;  %v2127_v31 = vld [vmem:[#allocation4 + $0x98] sm:$0xf0] }
  0x36   :  { %v2716_v37 = vld [vmem:[#allocation4 + $0x4] sm:$0xf0]  ;;  %v2126_v40 = vor.u32 %v2734_v20, %v2125_v19  ;;  %v2117_v42 = vld [vmem:[#allocation4 + $0x80] sm:$0xf]  ;;  %v2119_v54 = vld [vmem:[#allocation4 + $0x88] sm:$0xf0] }
  0x37   :  { %214 = vmatpush.bf16.msra.mxu0 %v1988_v46  ;;  %v2079_v46 = vld [vmem:[#allocation4 + $0x38] sm:$0xf0]  ;;  %558 = vmatpush.bf16.msra.mxu2 %v2078_v53  ;;  %v2731_v53 = vld [vmem:[#allocation4 + $0x84] sm:$0xf] }
  0x38   :  { %227 = vmatpush.bf16.msra.mxu1 %v1992_v48  ;;  %v247_v48 = vsub.f32 1.0, %v246_v32  ;;  %v2082_v57 = vor.u32 %v2721_v45, %v2079_v46  ;;  %571 = vmatpush.bf16.msra.mxu3 %v2142_v56  ;;  %v2130_v46 = vor.u32 %v2733_v30, %v2127_v31  ;;  %v2122_v0 = vor.u32 %v2731_v53, %v2119_v54 }
  0x3a   :  { %215 = vmatmul.bf16.vlgmr.msra.gmra.mxu0 %v124_v49  ;;  %v248_v2 = vmul.f32 %v3142_v18, %v247_v48  ;;  %v2055_v48 = vld [vmem:[#allocation4 + $0x8] sm:$0xf0] }
  0x3b   :  { %228 = vmatmul.bf16.vlgmr.msra.gmra.mxu1 %v124_v49  ;;  %580 = vmatpush.bf16.msrb.mxu0 %v2114_v59  ;;  %v2737_v49 = vld [vmem:[#allocation4 + $0xb4] sm:$0xf]  ;;  %v2133_v59 = vld [vmem:[#allocation4 + $0xa0] sm:$0xf] }
  0x3c   :  { %593 = vmatpush.bf16.msrb.mxu1 %v2178_v63  ;;  %v2146_v63 = vor.u32 %v2737_v49, %v2143_v50  ;;  %v2134_v16 = vor.u32 %v2736_v60, %v2133_v59  ;;  %v249_v26 = vadd.f32 %v3142_v18, %v248_v2  ;;  %559 = vmatpush.bf16.msra.mxu2 %v2070_v9 }
  0x3e   :  { %572 = vmatpush.bf16.msra.mxu3 %v2134_v16  ;;  %v3165_v49 = vsel %vm250_vm0, %v3142_v18, %v249_v26 }
  0x3f   :  { %581 = vmatpush.bf16.msrb.mxu0 %v2106_v8 }
  0x40   :  { %594 = vmatpush.bf16.msrb.mxu1 %v2170_v14 }
  0x42   :  { %573 = vmatpush.bf16.msra.mxu3 %v2126_v40 }
  0x43   :  { %582 = vmatpush.bf16.msrb.mxu0 %v2098_v24  ;;  %v2717_v24 = vld [vmem:[#allocation4 + $0x14] sm:$0xf] }
  0x44   :  { %595 = vmatpush.bf16.msrb.mxu1 %v2162_v28  ;;  %v2066_v41 = vor.u32 %v2717_v24, %v2063_v25 }
  0x47   :  { %583 = vmatpush.bf16.msrb.mxu0 %v2090_v39 }
  0x48   :  { %596 = vmatpush.bf16.msrb.mxu1 %v2154_v43  ;;  %v2732_v43 = vld [vmem:[#allocation4 + $0x84] sm:$0xf0] }
  0x4b   :  { %584 = vmatpush.bf16.msrb.mxu0 %v2082_v57 }
  0x4c   :  { %597 = vmatpush.bf16.msrb.mxu1 %v2146_v63 }
  0x4f   :  { %585 = vmatpush.bf16.msrb.mxu0 %v2074_v17 }
  0x50   :  { %598 = vmatpush.bf16.msrb.mxu1 %v2138_v23 }
  0x53   :  { %586 = vmatpush.bf16.msrb.mxu0 %v2066_v41 }
  0x54   :  { %599 = vmatpush.bf16.msrb.mxu1 %v2130_v46 }
  0x58   :  { %600 = vmatpush.bf16.msrb.mxu1 %v2122_v0 }
  0xb7   :  { %v216_v47 = vpop.f32.mrf.mxu0 }
  0xb8   :  { %v3147_v51 = vadd.f32 %v216_v47, %v125_v35  ;;  %v229_v52 = vpop.f32.mrf.mxu1  ;;  %v2062_v35 = vor.u32 %v2718_v11, %v2061_v10  ;;  %v2715_v47 = vld [vmem:[#allocation4 + $0x4] sm:$0xf] }
  0xb9   :  { %v3149_v55 = vadd.f32 %v229_v52, %v126_v36  ;;  %v2053_v36 = vld [vmem:[#allocation4] sm:$0xf] }
  0xba   :  { %v233_v61 = vrot.slane %v3147_v51, 4  ;;  %v254_v62 = vmul.f32 %v3147_v51, %v3147_v51  ;;  %560 = vmatpush.bf16.msra.mxu2 %v2062_v35  ;;  %v2054_v58 = vor.u32 %v2716_v37, %v2053_v36 }
  0xbb   :  { %v239_v3 = vrot.slane %v3149_v55, 4  ;;  %v255_v4 = vmul.f32 %v3149_v55, %v3149_v55 }
  0xbc   :  { %v234_v7 = vadd.f32 %v233_v61, %v3147_v51  ;;  %v256_v8 = vrot.slane %v254_v62, 4  ;;  %v2118_v61 = vor.u32 %v2732_v43, %v2117_v42 }
  0xbd   :  { %v240_v14 = vadd.f32 %v239_v3, %v3149_v55  ;;  %v262_v15 = vrot.slane %v255_v4, 4 }
  0xbe   :  { %v235_v21 = vrot.slane %v234_v7, 2  ;;  %v257_v22 = vadd.f32 %v256_v8, %v254_v62  ;;  %v2058_v62 = vor.u32 %v2715_v47, %v2055_v48  ;;  %561 = vmatpush.bf16.msra.mxu2 %v2054_v58  ;;  %574 = vmatpush.bf16.msra.mxu3 %v2118_v61 }
  0xbf   :  { %v241_v27 = vrot.slane %v240_v14, 2  ;;  %v263_v28 = vadd.f32 %v262_v15, %v255_v4  ;;  %v218_v29 = vpop.f32.mrf.mxu0 }
  0xc0   :  { %v236_v32 = vadd.f32 %v235_v21, %v234_v7  ;;  %v258_v33 = vrot.slane %v257_v22, 2  ;;  %v231_v34 = vpop.f32.mrf.mxu1  ;;  %587 = vmatpush.bf16.msrb.mxu0 %v2058_v62 }
  0xc1   :  { %v242_v38 = vadd.f32 %v241_v27, %v240_v14  ;;  %v264_v39 = vrot.slane %v263_v28, 2 }
  0xc2   :  { %v237_v44 = vrot.slane %v236_v32, 1  ;;  %v259_v45 = vadd.f32 %v258_v33, %v257_v22 }
  0xc3   :  { %v243_v50 = vrot.slane %v242_v38, 1  ;;  %v265_v52 = vadd.f32 %v264_v39, %v263_v28 }
  0xc4   :  { %v238_v56 = vadd.f32 %v237_v44, %v236_v32  ;;  %v260_v57 = vrot.slane %v259_v45, 1 }
  0xc5   :  { %v244_v59 = vadd.f32 %v243_v50, %v242_v38  ;;  %v266_v60 = vrot.slane %v265_v52, 1 }
  0xc6   :  { %v261_v63 = vadd.f32 %v260_v57, %v259_v45  ;;  %v252_v18 = vmul.f32 %v3165_v49, %v238_v56 }
  0xc7   :  { %v267_v1 = vadd.f32 %v266_v60, %v265_v52  ;;  %v253_v2 = vmul.f32 %v3165_v49, %v244_v59 }
  0xc8   :  { %v268_v3 = vmul.f32 %v261_v63, %v3165_v49  ;;  %v270_v4 = vmul.f32 %v252_v18, %v252_v18 }
  0xc9   :  { %v269_v5 = vmul.f32 %v267_v1, %v3165_v49  ;;  %v271_v6 = vmul.f32 %v253_v2, %v253_v2 }
  0xca   :  { %v272_v7 = vsub.f32 %v268_v3, %v270_v4 }
  0xcb   :  { %v273_v8 = vsub.f32 %v269_v5, %v271_v6 }
  0xcc   :  { %v274_v9 = vmax.f32 %v272_v7, 0.0 }
  0xcd   :  { %v275_v10 = vmax.f32 %v273_v8, 0.0 }
  0xce   :  { %v276_v11 = vadd.f32 1e-05, %v274_v9 }
  0xcf   :  { %v277_v14 = vadd.f32 1e-05, %v275_v10 }
  0xd0   :  { %2891 = vrsqrt.f32 %v276_v11  ;;  %vm284_vm3 = vweird.f32 %v276_v11 }
  0xd1   :  { %2893 = vrsqrt.f32 %v277_v14  ;;  %vm294_vm5 = vweird.f32 %v277_v14 }
  0xd6   :  { %v2892_v15 = vpop.eup %2891 }
  0xd7   :  { %v2894_v16 = vpop.eup %2893  ;;  %v279_v17 = vmul.f32 %v2892_v15, %v276_v11  ;;  %vm285_vm1 = vweird.f32 %v2892_v15 }
  0xd8   :  { %v289_v19 = vmul.f32 %v2894_v16, %v277_v14  ;;  %vm295_vm2 = vweird.f32 %v2894_v16  ;;  %vm286_vm4 = vmor %vm284_vm3, %vm285_vm1  ;;  %v393_v14 = vperm.slane %v3140_v13, 3 }
  0xd9   :  { %v280_v20 = vmul.f32 %v2892_v15, %v279_v17  ;;  %vm296_vm6 = vmor %vm294_vm5, %vm295_vm2  ;;  %v2777_v17 = vld [vmem:[#allocation4 + $0x1f4] sm:$0xf] }
  0xda   :  { %v290_v21 = vmul.f32 %v2894_v16, %v289_v19 }
  0xdb   :  { %v281_v22 = vmul.f32 0.5, %v280_v20  ;;  %v2305_v20 = vld [vmem:[#allocation4 + $0x1f8] sm:$0xf0] }
  0xdc   :  { %v291_v23 = vmul.f32 0.5, %v290_v21  ;;  %v2295_v21 = vld [vmem:[#allocation4 + $0x1e0] sm:$0xf] }
  0xdd   :  { %v282_v24 = vsub.f32 1.5, %v281_v22  ;;  %v2776_v22 = vld [vmem:[#allocation4 + $0x1e4] sm:$0xf0] }
  0xde   :  { %v292_v25 = vsub.f32 1.5, %v291_v23  ;;  %v2308_v23 = vor.u32 %v2777_v17, %v2305_v20  ;;  %v2754_v20 = vld [vmem:[#allocation4 + $0x134] sm:$0xf0] }
  0xdf   :  { %v283_v26 = vmul.f32 %v2892_v15, %v282_v24  ;;  %v2775_v24 = vld [vmem:[#allocation4 + $0x1e4] sm:$0xf] }
  0xe0   :  { %v293_v27 = vmul.f32 %v2894_v16, %v292_v25  ;;  %v2297_v25 = vld [vmem:[#allocation4 + $0x1e8] sm:$0xf0]  ;;  %959 = vmatpush.bf16.msra.mxu1 %v2308_v23 }
  0xe1   :  { %v287_v28 = vsel %vm286_vm4, %v2892_v15, %v283_v26  ;;  %v2303_v15 = vld [vmem:[#allocation4 + $0x1f0] sm:$0xf] }
  0xe2   :  { %v298_v29 = vmul.f32 %v287_v28, %v3138_v12  ;;  %v297_v30 = vsel %vm296_vm6, %v2894_v16, %v293_v27  ;;  %v2778_v16 = vld [vmem:[#allocation4 + $0x1f4] sm:$0xf0]  ;;  %v2239_v26 = vld [vmem:[#allocation4 + $0x170] sm:$0xf]  ;;  %v2296_v27 = vor.u32 %v2776_v22, %v2295_v21  ;;  %v2753_v21 = vld [vmem:[#allocation4 + $0x134] sm:$0xf] }
  0xe3   :  { %v299_v31 = vmul.f32 %v297_v30, %v3140_v13  ;;  %v2304_v19 = vor.u32 %v2778_v16, %v2303_v15  ;;  %v2762_v28 = vld [vmem:[#allocation4 + $0x174] sm:$0xf0]  ;;  %v2241_v30 = vld [vmem:[#allocation4 + $0x178] sm:$0xf0] }
  0xe4   :  { %v300_v32 = vmul.f32 %v298_v29, %v252_v18  ;;  %v310_v35 = vperm.slane %v298_v29, 1  ;;  %v2761_v29 = vld [vmem:[#allocation4 + $0x174] sm:$0xf] }
  0xe5   :  { %v301_v33 = vmul.f32 %v299_v31, %v253_v2  ;;  %v311_v37 = vperm.slane %v299_v31, 1  ;;  %933 = vmatpush.bf16.msrb.mxu3 %v2304_v19  ;;  %v2300_v31 = vor.u32 %v2775_v24, %v2297_v25  ;;  %v2263_v24 = vld [vmem:[#allocation4 + $0x1a0] sm:$0xf]  ;;  %v2768_v25 = vld [vmem:[#allocation4 + $0x1a4] sm:$0xf0] }
  0xe6   :  { %v304_v34 = vrot.slane %v300_v32, 7  ;;  %v312_v40 = vmul.f32 %v310_v35, %v3147_v51  ;;  %v2240_v32 = vor.u32 %v2762_v28, %v2239_v26  ;;  %v2774_v35 = vld [vmem:[#allocation4 + $0x1d4] sm:$0xf0]  ;;  %v2209_v26 = vld [vmem:[#allocation4 + $0x138] sm:$0xf0] }
  0xe7   :  { %v305_v36 = vrot.slane %v301_v33, 7  ;;  %v313_v42 = vmul.f32 %v311_v37, %v3149_v55  ;;  %v2244_v33 = vor.u32 %v2761_v29, %v2241_v30  ;;  %v2289_v37 = vld [vmem:[#allocation4 + $0x1d8] sm:$0xf0]  ;;  %960 = vmatpush.bf16.msra.mxu1 %v2300_v31 }
  0xe8   :  { %v308_v38 = vsub.f32 %v3138_v12, %v304_v34  ;;  %v2287_v34 = vld [vmem:[#allocation4 + $0x1d0] sm:$0xf]  ;;  %920 = vmatpush.bf16.msrb.mxu2 %v2240_v32  ;;  %v2767_v32 = vld [vmem:[#allocation4 + $0x1a4] sm:$0xf] }
  0xe9   :  { %v309_v39 = vsub.f32 %v3140_v13, %v305_v36  ;;  %v2773_v36 = vld [vmem:[#allocation4 + $0x1d4] sm:$0xf]  ;;  %946 = vmatpush.bf16.msra.mxu0 %v2244_v33  ;;  %934 = vmatpush.bf16.msrb.mxu3 %v2296_v27  ;;  %v2265_v33 = vld [vmem:[#allocation4 + $0x1a8] sm:$0xf0] }
  0xea   :  { %v314_v41 = vperm.slane %v308_v38, 2  ;;  %v2231_v38 = vld [vmem:[#allocation4 + $0x160] sm:$0xf] }
  0xeb   :  { %v315_v43 = vperm.slane %v309_v39, 2  ;;  %v2760_v39 = vld [vmem:[#allocation4 + $0x164] sm:$0xf0] }
  0xec   :  { %v316_v44 = vadd.f32 %v314_v41, %v312_v40  ;;  %v2232_v40 = vor.u32 %v2760_v39, %v2231_v38  ;;  %v2759_v41 = vld [vmem:[#allocation4 + $0x164] sm:$0xf] }
  0xed   :  { %v317_v45 = vadd.f32 %v315_v43, %v313_v42  ;;  %v2233_v42 = vld [vmem:[#allocation4 + $0x168] sm:$0xf0] }
  0xee   :  { %v2049_v46 = vmul.f32 -1.442695, %v316_v44  ;;  %921 = vmatpush.bf16.msrb.mxu2 %v2232_v40 }
  0xef   :  { %v2050_v47 = vmul.f32 -1.442695, %v317_v45 }
  0xf0   :  { %2895 = vpow2.f32 %v2049_v46  ;;  %v2279_v46 = vld [vmem:[#allocation4 + $0x1c0] sm:$0xf] }
  0xf1   :  { %2897 = vpow2.f32 %v2050_v47  ;;  %v2772_v47 = vld [vmem:[#allocation4 + $0x1c4] sm:$0xf0] }
  0xf6   :  { %v2896_v48 = vpop.eup %2895 }
  0xf7   :  { %v2898_v50 = vpop.eup %2897  ;;  %v324_v52 = vadd.f32 1.0, %v2896_v48 }
  0xf8   :  { %v325_v53 = vadd.f32 1.0, %v2898_v50 }
  0xf9   :  { %2899 = vrcp.f32 %v324_v52  ;;  %v337_v59 = vand.u32 2147483648, %v324_v52  ;;  %v335_v61 = vand.u32 2147483647, %v324_v52  ;;  %vm331_vm9 = vweird.f32 %v324_v52 }
  0xfa   :  { %2901 = vrcp.f32 %v325_v53  ;;  %v352_v62 = vand.u32 2147483648, %v325_v53  ;;  %v350_v0 = vand.u32 2147483647, %v325_v53  ;;  %vm346_vm11 = vweird.f32 %v325_v53 }
  0xfb   :  { %v338_v1 = vor.u32 1.1754944e-38, %v337_v59  ;;  %vm336_vm12 = vcmp.eq.f32.partialorder %v335_v61, 8.507059e+37 }
  0xfc   :  { %v353_v4 = vor.u32 1.1754944e-38, %v352_v62  ;;  %vm351_vm14 = vcmp.eq.f32.partialorder %v350_v0, 8.507059e+37  ;;  %v2215_v62 = vld [vmem:[#allocation4 + $0x140] sm:$0xf]  ;;  %v2756_v0 = vld [vmem:[#allocation4 + $0x144] sm:$0xf0] }
  0xff   :  { %v2900_v54 = vpop.eup %2899 }
 0x100   :  { %v2902_v56 = vpop.eup %2901  ;;  %v327_v57 = vmul.f32 %v2900_v54, %v324_v52  ;;  %vm332_vm7 = vweird.f32 %v2900_v54  ;;  %v2292_v52 = vor.u32 %v2773_v36, %v2289_v37  ;;  %v2199_v36 = vld [vmem:[#allocation4 + $0x120] sm:$0xf]  ;;  %v2752_v37 = vld [vmem:[#allocation4 + $0x124] sm:$0xf0] }
 0x101   :  { %v342_v51 = vmul.f32 %v2902_v56, %v325_v53  ;;  %vm347_vm8 = vweird.f32 %v2902_v56  ;;  %vm333_vm10 = vmor %vm331_vm9, %vm332_vm7  ;;  %v2223_v53 = vld [vmem:[#allocation4 + $0x150] sm:$0xf] }
 0x102   :  { %v328_v58 = vsub.f32 1.0, %v327_v57  ;;  %vm348_vm13 = vmor %vm346_vm11, %vm347_vm8  ;;  %v2771_v57 = vld [vmem:[#allocation4 + $0x1c4] sm:$0xf]  ;;  %961 = vmatpush.bf16.msra.mxu1 %v2292_v52 }
 0x103   :  { %v343_v55 = vsub.f32 1.0, %v342_v51  ;;  %v2281_v51 = vld [vmem:[#allocation4 + $0x1c8] sm:$0xf0] }
 0x104   :  { %v329_v60 = vmul.f32 %v2900_v54, %v328_v58  ;;  %v2225_v58 = vld [vmem:[#allocation4 + $0x158] sm:$0xf0] }
 0x105   :  { %v344_v63 = vmul.f32 %v2902_v56, %v343_v55  ;;  %v392_v55 = vperm.slane %v3138_v12, 3 }
 0x106   :  { %v330_v18 = vadd.f32 %v2900_v54, %v329_v60 }
 0x107   :  { %v345_v2 = vadd.f32 %v2902_v56, %v344_v63  ;;  %v2280_v63 = vor.u32 %v2772_v47, %v2279_v46  ;;  %v2255_v46 = vld [vmem:[#allocation4 + $0x190] sm:$0xf]  ;;  %v2766_v47 = vld [vmem:[#allocation4 + $0x194] sm:$0xf0] }
 0x108   :  { %v334_v3 = vsel %vm333_vm10, %v2900_v54, %v330_v18  ;;  %v2758_v54 = vld [vmem:[#allocation4 + $0x154] sm:$0xf0]  ;;  %v2755_v18 = vld [vmem:[#allocation4 + $0x144] sm:$0xf] }
 0x109   :  { %v339_v5 = vsel %vm336_vm12, %v338_v1, %v334_v3  ;;  %v349_v6 = vsel %vm348_vm13, %v2902_v56, %v345_v2  ;;  %v2757_v56 = vld [vmem:[#allocation4 + $0x154] sm:$0xf]  ;;  %v2224_v60 = vor.u32 %v2758_v54, %v2223_v53  ;;  %v2217_v1 = vld [vmem:[#allocation4 + $0x148] sm:$0xf0] }
 0x10a   :  { %v356_v7 = vmul.f32 %v339_v5, %v316_v44  ;;  %v354_v8 = vsel %vm351_vm14, %v353_v4, %v349_v6  ;;  %v2288_v44 = vor.u32 %v2774_v35, %v2287_v34  ;;  %v2228_v61 = vor.u32 %v2757_v56, %v2225_v58  ;;  %v2271_v5 = vld [vmem:[#allocation4 + $0x1b0] sm:$0xf]  ;;  %v2770_v6 = vld [vmem:[#allocation4 + $0x1b4] sm:$0xf0]  ;;  %v2765_v54 = vld [vmem:[#allocation4 + $0x194] sm:$0xf] }
 0x10b   :  { %v357_v9 = vmul.f32 %v354_v8, %v317_v45  ;;  %v2236_v45 = vor.u32 %v2759_v41, %v2233_v42  ;;  %v2284_v4 = vor.u32 %v2771_v57, %v2281_v51  ;;  %v2769_v8 = vld [vmem:[#allocation4 + $0x1b4] sm:$0xf]  ;;  %922 = vmatpush.bf16.msrb.mxu2 %v2224_v60  ;;  %v2220_v19 = vor.u32 %v2755_v18, %v2217_v1  ;;  %v2751_v42 = vld [vmem:[#allocation4 + $0x124] sm:$0xf]  ;;  %v2257_v56 = vld [vmem:[#allocation4 + $0x198] sm:$0xf0] }
 0x10c   :  { %v390_v10 = vpack.c.bf16 %v356_v7, %v356_v7  ;;  %935 = vmatpush.bf16.msrb.mxu3 %v2288_v44  ;;  %v2272_v23 = vor.u32 %v2770_v6, %v2271_v5  ;;  %v2212_v35 = vor.u32 %v2753_v21, %v2209_v26  ;;  %v2264_v44 = vor.u32 %v2768_v25, %v2263_v24  ;;  %v2750_v60 = vld [vmem:[#allocation4 + $0x114] sm:$0xf0]  ;;  %v2749_v1 = vld [vmem:[#allocation4 + $0x114] sm:$0xf] }
 0x10d   :  { %v391_v11 = vpack.c.bf16 %v357_v9, %v357_v9  ;;  %947 = vmatpush.bf16.msra.mxu0 %v2236_v45  ;;  %v2273_v9 = vld [vmem:[#allocation4 + $0x1b8] sm:$0xf0]  ;;  %962 = vmatpush.bf16.msra.mxu1 %v2284_v4  ;;  %v2268_v45 = vor.u32 %v2767_v32, %v2265_v33  ;;  %v2200_v51 = vor.u32 %v2752_v37, %v2199_v36 }
 0x10e   :  { %562 = vmatmul.bf16.vlgmr.msra.gmra.mxu2 %v390_v10  ;;  %588 = vmatmul.bf16.vlgmr.msrb.gmra.mxu0 %v390_v10  ;;  %v2216_v10 = vor.u32 %v2756_v0, %v2215_v62  ;;  %v2276_v31 = vor.u32 %v2769_v8, %v2273_v9  ;;  %v2260_v4 = vor.u32 %v2765_v54, %v2257_v56  ;;  %v2247_v8 = vld [vmem:[#allocation4 + $0x180] sm:$0xf]  ;;  %v2764_v9 = vld [vmem:[#allocation4 + $0x184] sm:$0xf0] }
 0x10f   :  { %575 = vmatmul.bf16.vlgmr.msra.gmra.mxu3 %v391_v11  ;;  %601 = vmatmul.bf16.vlgmr.msrb.gmra.mxu1 %v391_v11  ;;  %v2207_v11 = vld [vmem:[#allocation4 + $0x130] sm:$0xf] }
 0x110   :  { %936 = vmatpush.bf16.msrb.mxu3 %v2280_v63  ;;  %v2208_v34 = vor.u32 %v2754_v20, %v2207_v11  ;;  %923 = vmatpush.bf16.msrb.mxu2 %v2216_v10  ;;  %v2763_v11 = vld [vmem:[#allocation4 + $0x184] sm:$0xf] }
 0x111   :  { %948 = vmatpush.bf16.msra.mxu0 %v2228_v61  ;;  %963 = vmatpush.bf16.msra.mxu1 %v2276_v31 }
 0x114   :  { %937 = vmatpush.bf16.msrb.mxu3 %v2272_v23  ;;  %924 = vmatpush.bf16.msrb.mxu2 %v2208_v34 }
 0x115   :  { %949 = vmatpush.bf16.msra.mxu0 %v2220_v19  ;;  %964 = vmatpush.bf16.msra.mxu1 %v2268_v45 }
 0x118   :  { %938 = vmatpush.bf16.msrb.mxu3 %v2264_v44  ;;  %925 = vmatpush.bf16.msrb.mxu2 %v2200_v51 }
 0x119   :  { %950 = vmatpush.bf16.msra.mxu0 %v2212_v35  ;;  %965 = vmatpush.bf16.msra.mxu1 %v2260_v4 }
 0x18b   :  { %v589_v43 = vpop.f32.mrf.mxu0 }
 0x18c   :  { %v590_v48 = vadd.f32 %v589_v43, %v393_v14  ;;  %v602_v50 = vpop.f32.mrf.mxu1  ;;  %v2201_v43 = vld [vmem:[#allocation4 + $0x128] sm:$0xf0] }
 0x18d   :  { %v2204_v58 = vor.u32 %v2751_v42, %v2201_v43 }
 0x18e   :  { %v3178_v59 = vadd.f32 %v602_v50, %v590_v48 }
 0x18f   :  { %951 = vmatpush.bf16.msra.mxu0 %v2204_v58 }
 0x190   :  { %v612_v2 = vrot.slane %v3178_v59, 4  ;;  %v621_v3 = vmul.f32 %v3178_v59, %v3178_v59 }
 0x191   :  { %v563_v7 = vpop.f32.mrf.mxu2 }
 0x192   :  { %v613_v14 = vadd.f32 %v612_v2, %v3178_v59  ;;  %v628_v15 = vrot.slane %v621_v3, 4  ;;  %v564_v16 = vadd.f32 %v563_v7, %v392_v55  ;;  %v576_v17 = vpop.f32.mrf.mxu3  ;;  %v2191_v55 = vld [vmem:[#allocation4 + $0x110] sm:$0xf]  ;;  %v2193_v2 = vld [vmem:[#allocation4 + $0x118] sm:$0xf0] }
 0x193   :  { %v591_v22 = vpop.f32.mrf.mxu0 }
 0x194   :  { %v614_v27 = vrot.slane %v613_v14, 2  ;;  %v629_v28 = vadd.f32 %v628_v15, %v621_v3  ;;  %v3185_v29 = vadd.f32 %v576_v17, %v564_v16  ;;  %v604_v30 = vpop.f32.mrf.mxu1  ;;  %v2256_v3 = vor.u32 %v2766_v47, %v2255_v46 }
 0x195   :  { %v2192_v15 = vor.u32 %v2750_v60, %v2191_v55  ;;  %v2196_v16 = vor.u32 %v2749_v1, %v2193_v2  ;;  %v2248_v22 = vor.u32 %v2764_v9, %v2247_v8  ;;  %v2183_v1 = vld [vmem:[#allocation4 + $0x100] sm:$0xf]  ;;  %v2748_v2 = vld [vmem:[#allocation4 + $0x104] sm:$0xf0] }
 0x196   :  { %v615_v38 = vadd.f32 %v614_v27, %v613_v14  ;;  %v630_v39 = vrot.slane %v629_v28, 2  ;;  %v606_v40 = vrot.slane %v3185_v29, 4  ;;  %v620_v41 = vmul.f32 %v3185_v29, %v3185_v29  ;;  %v2249_v14 = vld [vmem:[#allocation4 + $0x188] sm:$0xf0]  ;;  %939 = vmatpush.bf16.msrb.mxu3 %v2256_v3 }
 0x197   :  { %v2252_v25 = vor.u32 %v2763_v11, %v2249_v14  ;;  %926 = vmatpush.bf16.msrb.mxu2 %v2192_v15  ;;  %952 = vmatpush.bf16.msra.mxu0 %v2196_v16  ;;  %v2184_v4 = vor.u32 %v2748_v2, %v2183_v1  ;;  %v2841_v1 = vld [vmem:[#allocation6 + $0x1ec] sm:$0xf0] }
 0x198   :  { %v616_v48 = vrot.slane %v615_v38, 1  ;;  %v631_v50 = vadd.f32 %v630_v39, %v629_v28  ;;  %v607_v52 = vadd.f32 %v606_v40, %v3185_v29  ;;  %v622_v53 = vrot.slane %v620_v41, 4 }
 0x199   :  { %v565_v57 = vpop.f32.mrf.mxu2  ;;  %966 = vmatpush.bf16.msra.mxu1 %v2252_v25 }
 0x19a   :  { %v617_v61 = vadd.f32 %v616_v48, %v615_v38  ;;  %v632_v62 = vrot.slane %v631_v50, 1  ;;  %v608_v63 = vrot.slane %v607_v52, 2  ;;  %v623_v0 = vadd.f32 %v622_v53, %v620_v41  ;;  %v578_v18 = vpop.f32.mrf.mxu3  ;;  %940 = vmatpush.bf16.msrb.mxu3 %v2248_v22 }
 0x19b   :  { %927 = vmatpush.bf16.msrb.mxu2 %v2184_v4  ;;  %v2555_v4 = vld [vmem:[#allocation6 + $0x1f0] sm:$0xf0] }
 0x19c   :  { %v633_v5 = vadd.f32 %v632_v62, %v631_v50  ;;  %v609_v6 = vadd.f32 %v608_v63, %v607_v52  ;;  %v624_v7 = vrot.slane %v623_v0, 2  ;;  %v619_v10 = vmul.f32 %v617_v61, %v3165_v49 }
 0x19e   :  { %v635_v17 = vmul.f32 %v633_v5, %v3165_v49  ;;  %v610_v19 = vrot.slane %v609_v6, 1  ;;  %v625_v20 = vadd.f32 %v624_v7, %v623_v0  ;;  %v637_v21 = vmul.f32 %v619_v10, %v619_v10  ;;  %v2747_v5 = vld [vmem:[#allocation4 + $0x104] sm:$0xf] }
 0x1a0   :  { %v611_v23 = vadd.f32 %v610_v19, %v609_v6  ;;  %v626_v24 = vrot.slane %v625_v20, 1  ;;  %v639_v26 = vsub.f32 %v635_v17, %v637_v21  ;;  %v2185_v6 = vld [vmem:[#allocation4 + $0x108] sm:$0xf0] }
 0x1a1   :  { %v2188_v7 = vor.u32 %v2747_v5, %v2185_v6 }
 0x1a2   :  { %v627_v27 = vadd.f32 %v626_v24, %v625_v20  ;;  %v641_v28 = vmax.f32 %v639_v26, 0.0  ;;  %v618_v30 = vmul.f32 %v611_v23, %v3165_v49 }
 0x1a3   :  { %953 = vmatpush.bf16.msra.mxu0 %v2188_v7 }
 0x1a4   :  { %v634_v31 = vmul.f32 %v627_v27, %v3165_v49  ;;  %v643_v32 = vadd.f32 1e-05, %v641_v28  ;;  %v636_v33 = vmul.f32 %v618_v30, %v618_v30 }
 0x1a6   :  { %2903 = vrsqrt.f32 %v643_v32  ;;  %v638_v34 = vsub.f32 %v634_v31, %v636_v33  ;;  %vm660_vm0 = vweird.f32 %v643_v32 }
 0x1a8   :  { %v640_v35 = vmax.f32 %v638_v34, 0.0 }
 0x1aa   :  { %v642_v36 = vadd.f32 1e-05, %v640_v35 }
 0x1ac   :  { %v2904_v37 = vpop.eup %2903  ;;  %2905 = vrsqrt.f32 %v642_v36  ;;  %vm650_vm3 = vweird.f32 %v642_v36 }
 0x1ad   :  { %v655_v38 = vmul.f32 %v2904_v37, %v643_v32  ;;  %vm661_vm15 = vweird.f32 %v2904_v37 }
 0x1ae   :  { %vm662_vm1 = vmor %vm660_vm0, %vm661_vm15 }
 0x1af   :  { %v656_v39 = vmul.f32 %v2904_v37, %v655_v38 }
 0x1b1   :  { %v657_v40 = vmul.f32 0.5, %v656_v39 }
 0x1b2   :  { %v2906_v41 = vpop.eup %2905 }
 0x1b3   :  { %v658_v42 = vsub.f32 1.5, %v657_v40  ;;  %v645_v43 = vmul.f32 %v2906_v41, %v642_v36  ;;  %vm651_vm2 = vweird.f32 %v2906_v41 }
 0x1b4   :  { %vm652_vm4 = vmor %vm650_vm3, %vm651_vm2 }
 0x1b5   :  { %v659_v44 = vmul.f32 %v2904_v37, %v658_v42  ;;  %v646_v45 = vmul.f32 %v2906_v41, %v645_v43  ;;  %v759_v43 = vperm.slane %v3140_v13, 6 }
 0x1b7   :  { %v663_v46 = vsel %vm662_vm1, %v2904_v37, %v659_v44  ;;  %v647_v47 = vmul.f32 0.5, %v646_v45 }
 0x1b8   :  { %v665_v48 = vmul.f32 %v663_v46, %v3140_v13 }
 0x1b9   :  { %v648_v50 = vsub.f32 1.5, %v647_v47 }
 0x1ba   :  { %v667_v52 = vmul.f32 %v665_v48, %v619_v10  ;;  %v677_v56 = vperm.slane %v665_v48, 4 }
 0x1bb   :  { %v649_v53 = vmul.f32 %v2906_v41, %v648_v50  ;;  %v758_v50 = vperm.slane %v3138_v12, 6 }
 0x1bc   :  { %v671_v54 = vrot.slane %v667_v52, 7  ;;  %v679_v55 = vmul.f32 %v677_v56, %v3178_v59 }
 0x1bd   :  { %v653_v57 = vsel %vm652_vm4, %v2906_v41, %v649_v53 }
 0x1be   :  { %v675_v51 = vsub.f32 %v3140_v13, %v671_v54  ;;  %v664_v58 = vmul.f32 %v653_v57, %v3138_v12 }
 0x1c0   :  { %v681_v60 = vperm.slane %v675_v51, 5  ;;  %v666_v61 = vmul.f32 %v664_v58, %v618_v30  ;;  %v676_v0 = vperm.slane %v664_v58, 4 }
 0x1c2   :  { %v683_v62 = vadd.f32 %v681_v60, %v679_v55  ;;  %v670_v63 = vrot.slane %v666_v61, 7  ;;  %v678_v8 = vmul.f32 %v676_v0, %v3185_v29 }
 0x1c4   :  { %v2180_v18 = vmul.f32 -1.442695, %v683_v62  ;;  %v674_v3 = vsub.f32 %v3138_v12, %v670_v63 }
 0x1c6   :  { %2907 = vpow2.f32 %v2180_v18  ;;  %v680_v9 = vperm.slane %v674_v3, 5  ;;  %v2553_v18 = vld [vmem:[#allocation6 + $0x1e0] sm:$0xf]  ;;  %v2839_v3 = vld [vmem:[#allocation6 + $0x1e4] sm:$0xf] }
 0x1c7   :  { %v2554_v2 = vor.u32 %v2841_v1, %v2553_v18 }
 0x1c8   :  { %v682_v59 = vadd.f32 %v680_v9, %v678_v8 }
 0x1c9   :  { %1493 = vmatpush.bf16.msra.mxu3 %v2554_v2  ;;  %v2801_v2 = vld [vmem:[#allocation6 + $0xac] sm:$0xf0] }
 0x1ca   :  { %v2179_v10 = vmul.f32 -1.442695, %v682_v59 }
 0x1cc   :  { %v2908_v11 = vpop.eup %2907  ;;  %2909 = vpow2.f32 %v2179_v10 }
 0x1cd   :  { %v691_v14 = vadd.f32 1.0, %v2908_v11 }
 0x1cf   :  { %2911 = vrcp.f32 %v691_v14  ;;  %v718_v21 = vand.u32 2147483648, %v691_v14  ;;  %v716_v23 = vand.u32 2147483647, %v691_v14  ;;  %vm712_vm6 = vweird.f32 %v691_v14 }
 0x1d1   :  { %v719_v26 = vor.u32 1.1754944e-38, %v718_v21  ;;  %vm717_vm8 = vcmp.eq.f32.partialorder %v716_v23, 8.507059e+37  ;;  %v2539_v21 = vld [vmem:[#allocation6 + $0x1d0] sm:$0xf0] }
 0x1d2   :  { %v2910_v15 = vpop.eup %2909 }
 0x1d3   :  { %v690_v16 = vadd.f32 1.0, %v2910_v15 }
 0x1d5   :  { %v2912_v17 = vpop.eup %2911  ;;  %2913 = vrcp.f32 %v690_v16  ;;  %v703_v31 = vand.u32 2147483648, %v690_v16  ;;  %v701_v34 = vand.u32 2147483647, %v690_v16  ;;  %vm697_vm10 = vweird.f32 %v690_v16 }
 0x1d6   :  { %v708_v19 = vmul.f32 %v2912_v17, %v691_v14  ;;  %vm713_vm5 = vweird.f32 %v2912_v17 }
 0x1d7   :  { %vm714_vm7 = vmor %vm712_vm6, %vm713_vm5  ;;  %v704_v37 = vor.u32 1.1754944e-38, %v703_v31  ;;  %vm702_vm12 = vcmp.eq.f32.partialorder %v701_v34, 8.507059e+37  ;;  %v2427_v31 = vld [vmem:[#allocation6 + $0xf0] sm:$0xf0] }
 0x1d8   :  { %v709_v20 = vsub.f32 1.0, %v708_v19 }
 0x1da   :  { %v710_v22 = vmul.f32 %v2912_v17, %v709_v20  ;;  %v2835_v20 = vld [vmem:[#allocation6 + $0x1c4] sm:$0xf] }
 0x1db   :  { %v2914_v29 = vpop.eup %2913 }
 0x1dc   :  { %v711_v24 = vadd.f32 %v2912_v17, %v710_v22  ;;  %v693_v25 = vmul.f32 %v2914_v29, %v690_v16  ;;  %vm698_vm9 = vweird.f32 %v2914_v29  ;;  %v2537_v16 = vld [vmem:[#allocation6 + $0x1c0] sm:$0xf] }
 0x1dd   :  { %vm699_vm11 = vmor %vm697_vm10, %vm698_vm9 }
 0x1de   :  { %v715_v27 = vsel %vm714_vm7, %v2912_v17, %v711_v24  ;;  %v694_v28 = vsub.f32 1.0, %v693_v25  ;;  %v2837_v17 = vld [vmem:[#allocation6 + $0x1cc] sm:$0xf0]  ;;  %v2425_v25 = vld [vmem:[#allocation6 + $0xe0] sm:$0xf] }
 0x1df   :  { %v720_v30 = vsel %vm717_vm8, %v719_v26, %v715_v27  ;;  %v2538_v19 = vor.u32 %v2837_v17, %v2537_v16  ;;  %v2809_v26 = vld [vmem:[#allocation6 + $0xec] sm:$0xf0]  ;;  %v2542_v27 = vor.u32 %v2835_v20, %v2539_v21  ;;  %v2795_v16 = vld [vmem:[#allocation6 + $0x84] sm:$0xf]  ;;  %v2379_v17 = vld [vmem:[#allocation6 + $0x90] sm:$0xf0] }
 0x1e0   :  { %v723_v32 = vmul.f32 %v720_v30, %v683_v62  ;;  %v695_v33 = vmul.f32 %v2914_v29, %v694_v28  ;;  %v2426_v28 = vor.u32 %v2809_v26, %v2425_v25  ;;  %v2807_v30 = vld [vmem:[#allocation6 + $0xe4] sm:$0xf]  ;;  %v2473_v21 = vld [vmem:[#allocation6 + $0x140] sm:$0xf]  ;;  %v2475_v26 = vld [vmem:[#allocation6 + $0x150] sm:$0xf0] }
 0x1e1   :  { %1494 = vmatpush.bf16.msra.mxu3 %v2538_v19  ;;  %v2819_v25 = vld [vmem:[#allocation6 + $0x144] sm:$0xf] }
 0x1e2   :  { %v757_v35 = vpack.c.bf16 %v723_v32, %v723_v32  ;;  %v696_v36 = vadd.f32 %v2914_v29, %v695_v33  ;;  %1480 = vmatpush.bf16.msra.mxu2 %v2426_v28 }
 0x1e4   :  { %941 = vmatmul.bf16.vlgmr.msrb.gmra.mxu3 %v757_v35  ;;  %967 = vmatmul.bf16.vlgmr.msra.gmra.mxu1 %v757_v35  ;;  %v700_v38 = vsel %vm699_vm11, %v2914_v29, %v696_v36  ;;  %v2521_v36 = vld [vmem:[#allocation6 + $0x1a0] sm:$0xf] }
 0x1e5   :  { %v705_v39 = vsel %vm702_vm12, %v704_v37, %v700_v38  ;;  %v2833_v37 = vld [vmem:[#allocation6 + $0x1ac] sm:$0xf0]  ;;  %v2430_v38 = vor.u32 %v2807_v30, %v2427_v31  ;;  %v2791_v31 = vld [vmem:[#allocation6 + $0x64] sm:$0xf] }
 0x1e6   :  { %v722_v40 = vmul.f32 %v705_v39, %v682_v59  ;;  %v2558_v59 = vor.u32 %v2839_v3, %v2555_v4  ;;  %v2522_v39 = vor.u32 %v2833_v37, %v2521_v36  ;;  %v2799_v3 = vld [vmem:[#allocation6 + $0xa4] sm:$0xf]  ;;  %v2793_v30 = vld [vmem:[#allocation6 + $0x6c] sm:$0xf0] }
 0x1e7   :  { %1506 = vmatpush.bf16.msrb.mxu0 %v2430_v38  ;;  %v2817_v36 = vld [vmem:[#allocation6 + $0x12c] sm:$0xf0]  ;;  %v2815_v38 = vld [vmem:[#allocation6 + $0x124] sm:$0xf] }
 0x1e8   :  { %v756_v41 = vpack.c.bf16 %v722_v40, %v722_v40  ;;  %1519 = vmatpush.bf16.msrb.mxu1 %v2558_v59  ;;  %v2831_v40 = vld [vmem:[#allocation6 + $0x1a4] sm:$0xf]  ;;  %1495 = vmatpush.bf16.msra.mxu3 %v2522_v39  ;;  %v2459_v39 = vld [vmem:[#allocation6 + $0x130] sm:$0xf0] }
 0x1e9   :  { %v2823_v59 = vld [vmem:[#allocation6 + $0x164] sm:$0xf] }
 0x1ea   :  { %928 = vmatmul.bf16.vlgmr.msrb.gmra.mxu2 %v756_v41  ;;  %954 = vmatmul.bf16.vlgmr.msra.gmra.mxu0 %v756_v41  ;;  %v2523_v41 = vld [vmem:[#allocation6 + $0x1b0] sm:$0xf0] }
 0x1ec   :  { %1520 = vmatpush.bf16.msrb.mxu1 %v2542_v27  ;;  %v2361_v27 = vld [vmem:[#allocation6 + $0x60] sm:$0xf] }
 0x261   :  { %v968_v42 = vpop.f32.mrf.mxu1 }
 0x267   :  { %v942_v44 = vpop.f32.mrf.mxu3  ;;  %v955_v45 = vpop.f32.mrf.mxu0 }
 0x268   :  { %v956_v46 = vadd.f32 %v955_v45, %v759_v43  ;;  %v2526_v45 = vor.u32 %v2831_v40, %v2523_v41  ;;  %v2345_v40 = vld [vmem:[#allocation6 + $0x40] sm:$0xf] }
 0x269   :  { %v970_v47 = vpop.f32.mrf.mxu1 }
 0x26a   :  { %v3202_v48 = vadd.f32 %v968_v42, %v956_v46  ;;  %v2409_v46 = vld [vmem:[#allocation6 + $0xc0] sm:$0xf]  ;;  %v2805_v47 = vld [vmem:[#allocation6 + $0xcc] sm:$0xf0]  ;;  %1521 = vmatpush.bf16.msrb.mxu1 %v2526_v45  ;;  %v2787_v45 = vld [vmem:[#allocation6 + $0x44] sm:$0xf] }
 0x26c   :  { %v978_v52 = vrot.slane %v3202_v48, 4  ;;  %v987_v53 = vmul.f32 %v3202_v48, %v3202_v48 }
 0x26d   :  { %v929_v54 = vpop.f32.mrf.mxu2 }
 0x26e   :  { %v979_v56 = vadd.f32 %v978_v52, %v3202_v48  ;;  %v994_v57 = vrot.slane %v987_v53, 4  ;;  %v930_v51 = vadd.f32 %v929_v54, %v758_v50  ;;  %v2410_v50 = vor.u32 %v2805_v47, %v2409_v46  ;;  %v2803_v52 = vld [vmem:[#allocation6 + $0xc4] sm:$0xf]  ;;  %v2347_v46 = vld [vmem:[#allocation6 + $0x50] sm:$0xf0] }
 0x26f   :  { %v944_v58 = vpop.f32.mrf.mxu3  ;;  %v957_v13 = vpop.f32.mrf.mxu0  ;;  %v2441_v47 = vld [vmem:[#allocation6 + $0x100] sm:$0xf] }
 0x270   :  { %v980_v55 = vrot.slane %v979_v56, 2  ;;  %v995_v60 = vadd.f32 %v994_v57, %v987_v53  ;;  %v3209_v61 = vadd.f32 %v942_v44, %v930_v51  ;;  %v2411_v53 = vld [vmem:[#allocation6 + $0xd0] sm:$0xf0]  ;;  %v2505_v58 = vld [vmem:[#allocation6 + $0x180] sm:$0xf]  ;;  %1481 = vmatpush.bf16.msra.mxu2 %v2410_v50 }
 0x271   :  { %v2414_v51 = vor.u32 %v2803_v52, %v2411_v53  ;;  %v2829_v13 = vld [vmem:[#allocation6 + $0x18c] sm:$0xf0]  ;;  %v2462_v53 = vor.u32 %v2815_v38, %v2459_v39  ;;  %v2834_v39 = vld [vmem:[#allocation6 + $0x1b4] sm:$0xf0] }
 0x272   :  { %v981_v62 = vadd.f32 %v980_v55, %v979_v56  ;;  %v996_v63 = vrot.slane %v995_v60, 2  ;;  %v972_v12 = vrot.slane %v3209_v61, 4  ;;  %v986_v0 = vmul.f32 %v3209_v61, %v3209_v61  ;;  %v2813_v50 = vld [vmem:[#allocation6 + $0x10c] sm:$0xf0] }
 0x273   :  { %v2506_v55 = vor.u32 %v2829_v13, %v2505_v58  ;;  %1507 = vmatpush.bf16.msrb.mxu0 %v2414_v51  ;;  %v2443_v51 = vld [vmem:[#allocation6 + $0x110] sm:$0xf0]  ;;  %v2561_v58 = vld [vmem:[#allocation6 + $0x1e8] sm:$0xf]  ;;  %v2842_v13 = vld [vmem:[#allocation6 + $0x1f4] sm:$0xf0] }
 0x274   :  { %v982_v5 = vrot.slane %v981_v62, 1  ;;  %v997_v6 = vadd.f32 %v996_v63, %v995_v60  ;;  %v973_v7 = vadd.f32 %v972_v12, %v3209_v61  ;;  %v988_v8 = vrot.slane %v986_v0, 4  ;;  %v2827_v60 = vld [vmem:[#allocation6 + $0x184] sm:$0xf]  ;;  %v2393_v63 = vld [vmem:[#allocation6 + $0xa0] sm:$0xf] }
 0x275   :  { %v931_v9 = vpop.f32.mrf.mxu2  ;;  %1496 = vmatpush.bf16.msra.mxu3 %v2506_v55  ;;  %v2394_v4 = vor.u32 %v2801_v2, %v2393_v63  ;;  %v2840_v55 = vld [vmem:[#allocation6 + $0x1ec] sm:$0xf]  ;;  %v2350_v63 = vor.u32 %v2787_v45, %v2347_v46 }
 0x276   :  { %v983_v10 = vadd.f32 %v982_v5, %v981_v62  ;;  %v998_v11 = vrot.slane %v997_v6, 1  ;;  %v974_v14 = vrot.slane %v973_v7, 2  ;;  %v989_v15 = vadd.f32 %v988_v8, %v986_v0  ;;  %v2507_v62 = vld [vmem:[#allocation6 + $0x190] sm:$0xf0] }
 0x277   :  { %v2510_v1 = vor.u32 %v2827_v60, %v2507_v62  ;;  %v2395_v5 = vld [vmem:[#allocation6 + $0xb0] sm:$0xf0]  ;;  %1482 = vmatpush.bf16.msra.mxu2 %v2394_v4  ;;  %v2563_v60 = vld [vmem:[#allocation6 + $0x1f8] sm:$0xf0]  ;;  %v2783_v4 = vld [vmem:[#allocation6 + $0x24] sm:$0xf] }
 0x278   :  { %v3216_v22 = vmul.f32 %v983_v10, %v3165_v49  ;;  %v999_v23 = vadd.f32 %v998_v11, %v997_v6  ;;  %v975_v29 = vadd.f32 %v974_v14, %v973_v7  ;;  %v990_v24 = vrot.slane %v989_v15, 2  ;;  %v2489_v6 = vld [vmem:[#allocation6 + $0x160] sm:$0xf]  ;;  %v2825_v7 = vld [vmem:[#allocation6 + $0x16c] sm:$0xf0] }
 0x279   :  { %v2398_v9 = vor.u32 %v2799_v3, %v2395_v5  ;;  %v2491_v10 = vld [vmem:[#allocation6 + $0x170] sm:$0xf0]  ;;  %v2377_v11 = vld [vmem:[#allocation6 + $0x80] sm:$0xf]  ;;  %1522 = vmatpush.bf16.msrb.mxu1 %v2510_v1  ;;  %v2785_v1 = vld [vmem:[#allocation6 + $0x2c] sm:$0xf0]  ;;  %v2562_v3 = vor.u32 %v2842_v13, %v2561_v58 }
 0x27a   :  { %v1001_v32 = vmul.f32 %v999_v23, %v3165_v49  ;;  %v1003_v33 = vmul.f32 %v3216_v22, %v3216_v22  ;;  %v976_v34 = vrot.slane %v975_v29, 1  ;;  %v991_v35 = vadd.f32 %v990_v24, %v989_v15  ;;  %v2797_v15 = vld [vmem:[#allocation6 + $0x8c] sm:$0xf0]  ;;  %v2331_v5 = vld [vmem:[#allocation6 + $0x30] sm:$0xf0] }
 0x27b   :  { %v2494_v14 = vor.u32 %v2823_v59, %v2491_v10  ;;  %v2378_v20 = vor.u32 %v2797_v15, %v2377_v11  ;;  %v2821_v23 = vld [vmem:[#allocation6 + $0x14c] sm:$0xf0]  ;;  %1508 = vmatpush.bf16.msrb.mxu0 %v2398_v9  ;;  %v2545_v10 = vld [vmem:[#allocation6 + $0x1c8] sm:$0xf]  ;;  %v2838_v11 = vld [vmem:[#allocation6 + $0x1d4] sm:$0xf0] }
 0x27c   :  { %v1005_v42 = vsub.f32 %v1001_v32, %v1003_v33  ;;  %v977_v43 = vadd.f32 %v976_v34, %v975_v29  ;;  %v992_v44 = vrot.slane %v991_v35, 1  ;;  %v2382_v29 = vor.u32 %v2795_v16, %v2379_v17  ;;  %v2363_v34 = vld [vmem:[#allocation6 + $0x70] sm:$0xf0]  ;;  %v2313_v15 = vld [vmem:[#allocation6] sm:$0xf] }
 0x27d   :  { %v2474_v24 = vor.u32 %v2821_v23, %v2473_v21  ;;  %1523 = vmatpush.bf16.msrb.mxu1 %v2494_v14  ;;  %1483 = vmatpush.bf16.msra.mxu2 %v2378_v20  ;;  %v2478_v32 = vor.u32 %v2819_v25, %v2475_v26  ;;  %v2362_v33 = vor.u32 %v2793_v30, %v2361_v27  ;;  %v2547_v14 = vld [vmem:[#allocation6 + $0x1d8] sm:$0xf0]  ;;  %v2781_v20 = vld [vmem:[#allocation6 + $0xc] sm:$0xf0]  ;;  %v2779_v21 = vld [vmem:[#allocation6 + $0x4] sm:$0xf] }
 0x27e   :  { %v1007_v54 = vmax.f32 %v1005_v42, 0.0  ;;  %v3222_v56 = vmul.f32 %v977_v43, %v3165_v49  ;;  %v993_v57 = vadd.f32 %v992_v44, %v991_v35  ;;  %v2457_v35 = vld [vmem:[#allocation6 + $0x120] sm:$0xf]  ;;  %v2366_v42 = vor.u32 %v2791_v31, %v2363_v34  ;;  %v2789_v44 = vld [vmem:[#allocation6 + $0x4c] sm:$0xf0]  ;;  %v2943_v34 = vld [vmem:[#allocation9 + $0x8] sm:$0xff] }
 0x27f   :  { %1509 = vmatpush.bf16.msrb.mxu0 %v2382_v29  ;;  %v2458_v43 = vor.u32 %v2817_v36, %v2457_v35  ;;  %v2315_v23 = vld [vmem:[#allocation6 + $0x10] sm:$0xf0]  ;;  %v2546_v29 = vor.u32 %v2838_v11, %v2545_v10  ;;  %v2810_v25 = vld [vmem:[#allocation6 + $0xf4] sm:$0xf0]  ;;  %v2808_v26 = vld [vmem:[#allocation6 + $0xec] sm:$0xf]  ;;  %v2314_v31 = vor.u32 %v2781_v20, %v2313_v15 }
 0x280   :  { %v3224_v12 = vadd.f32 1e-05, %v1007_v54  ;;  %v1000_v0 = vmul.f32 %v993_v57, %v3165_v49  ;;  %v1002_v18 = vmul.f32 %v3222_v56, %v3222_v56  ;;  %v2490_v49 = vor.u32 %v2825_v7, %v2489_v6  ;;  %v2811_v57 = vld [vmem:[#allocation6 + $0x104] sm:$0xf]  ;;  %v2497_v15 = vld [vmem:[#allocation6 + $0x168] sm:$0xf] }
 0x281   :  { %1524 = vmatpush.bf16.msrb.mxu1 %v2478_v32  ;;  %1484 = vmatpush.bf16.msra.mxu2 %v2362_v33  ;;  %v2346_v54 = vor.u32 %v2789_v44, %v2345_v40  ;;  %v2446_v9 = vor.u32 %v2811_v57, %v2443_v51  ;;  %v2435_v32 = vld [vmem:[#allocation6 + $0xf8] sm:$0xf0]  ;;  %v2529_v33 = vld [vmem:[#allocation6 + $0x1a8] sm:$0xf]  ;;  %v2832_v40 = vld [vmem:[#allocation6 + $0x1ac] sm:$0xf] }
 0x282   :  { %2915 = vrsqrt.f32 %v3224_v12  ;;  %v1004_v8 = vsub.f32 %v1000_v0, %v1002_v18  ;;  %1497 = vmatpush.bf16.msra.mxu3 %v2490_v49  ;;  %v2442_v0 = vor.u32 %v2813_v50, %v2441_v47  ;;  %v2329_v18 = vld [vmem:[#allocation6 + $0x20] sm:$0xf]  ;;  %vm1026_vm14 = vweird.f32 %v3224_v12  ;;  %v2836_v49 = vld [vmem:[#allocation6 + $0x1cc] sm:$0xf]  ;;  %v2806_v44 = vld [vmem:[#allocation6 + $0xd4] sm:$0xf0] }
 0x283   :  { %1510 = vmatpush.bf16.msrb.mxu0 %v2366_v42  ;;  %v2330_v59 = vor.u32 %v2785_v1, %v2329_v18  ;;  %v2550_v36 = vor.u32 %v2836_v49, %v2547_v14  ;;  %v2438_v45 = vor.u32 %v2808_v26, %v2435_v32  ;;  %v2530_v46 = vor.u32 %v2834_v39, %v2529_v33  ;;  %v2804_v47 = vld [vmem:[#allocation6 + $0xcc] sm:$0xf]  ;;  %v2513_v57 = vld [vmem:[#allocation6 + $0x188] sm:$0xf]  ;;  %v2830_v51 = vld [vmem:[#allocation6 + $0x194] sm:$0xf0] }
 0x284   :  { %v1006_v19 = vmax.f32 %v1004_v8, 0.0  ;;  %v3256_v50 = vld [vmem:[#allocation9 + $0x28] sm:$0xff]  ;;  %v2944_v18 = vld [vmem:[#allocation9] sm:$0xff]  ;;  %v2822_v32 = vld [vmem:[#allocation6 + $0x154] sm:$0xf0] }
 0x285   :  { %1525 = vmatpush.bf16.msrb.mxu1 %v2462_v53  ;;  %1485 = vmatpush.bf16.msra.mxu2 %v2346_v54  ;;  %v2419_v54 = vld [vmem:[#allocation6 + $0xd8] sm:$0xf0]  ;;  %v3267_v11 = vld [vmem:[#allocation9 + $0x20] sm:$0xff]  ;;  %v2796_v26 = vld [vmem:[#allocation6 + $0x8c] sm:$0xf] }
 0x286   :  { %v3230_v28 = vadd.f32 1e-05, %v1006_v19  ;;  %1498 = vmatpush.bf16.msra.mxu3 %v2474_v24  ;;  %v2334_v19 = vor.u32 %v2783_v4, %v2331_v5  ;;  %v2433_v24 = vld [vmem:[#allocation6 + $0xe8] sm:$0xf]  ;;  %v2514_v4 = vor.u32 %v2830_v51, %v2513_v57  ;;  %v2800_v5 = vld [vmem:[#allocation6 + $0xac] sm:$0xf] }
 0x287   :  { %1511 = vmatpush.bf16.msrb.mxu0 %v2350_v63  ;;  %v2434_v38 = vor.u32 %v2810_v25, %v2433_v24  ;;  %v2401_v63 = vld [vmem:[#allocation6 + $0xa8] sm:$0xf]  ;;  %v2798_v24 = vld [vmem:[#allocation6 + $0x94] sm:$0xf0]  ;;  %v2820_v33 = vld [vmem:[#allocation6 + $0x14c] sm:$0xf] }
 0x288   :  { %v3232_v37 = vpop.eup %2915  ;;  %2917 = vrsqrt.f32 %v3230_v28  ;;  %vm1016_vm1 = vweird.f32 %v3230_v28 }
 0x289   :  { %v1021_v41 = vmul.f32 %v3232_v37, %v3224_v12  ;;  %vm1027_vm13 = vweird.f32 %v3232_v37  ;;  %v2566_v12 = vor.u32 %v2840_v55, %v2563_v60  ;;  %1526 = vmatpush.bf16.msrb.mxu1 %v2446_v9  ;;  %1486 = vmatpush.bf16.msra.mxu2 %v2330_v59  ;;  %v2828_v55 = vld [vmem:[#allocation6 + $0x18c] sm:$0xf]  ;;  %v2515_v60 = vld [vmem:[#allocation6 + $0x198] sm:$0xf0] }
 0x28a   :  { %1499 = vmatpush.bf16.msra.mxu3 %v2458_v43  ;;  %vm3244_vm15 = vmor %vm1026_vm14, %vm1027_vm13  ;;  %v2318_v43 = vor.u32 %v2779_v21, %v2315_v23  ;;  %v2499_v21 = vld [vmem:[#allocation6 + $0x178] sm:$0xf0] }
 0x28b   :  { %v1022_v52 = vmul.f32 %v3232_v37, %v1021_v41  ;;  %v2531_v41 = vld [vmem:[#allocation6 + $0x1b8] sm:$0xf0]  ;;  %1512 = vmatpush.bf16.msrb.mxu0 %v2334_v19 }
 0x28c   :  { %v2534_v58 = vor.u32 %v2832_v40, %v2531_v41  ;;  %v2369_v41 = vld [vmem:[#allocation6 + $0x68] sm:$0xf] }
 0x28d   :  { %v1023_v62 = vmul.f32 0.5, %v1022_v52  ;;  %1571 = vmatpush.bf16.msra.mxu1 %v2566_v12  ;;  %1487 = vmatpush.bf16.msra.mxu2 %v2314_v31 }
 0x28e   :  { %v3239_v2 = vpop.eup %2917  ;;  %1500 = vmatpush.bf16.msra.mxu3 %v2442_v0  ;;  %v2802_v0 = vld [vmem:[#allocation6 + $0xb4] sm:$0xf0] }
 0x28f   :  { %v1024_v6 = vsub.f32 1.5, %v1023_v62  ;;  %v1011_v8 = vmul.f32 %v3239_v2, %v3230_v28  ;;  %vm1017_vm0 = vweird.f32 %v3239_v2  ;;  %1513 = vmatpush.bf16.msrb.mxu0 %v2318_v43  ;;  %v2402_v9 = vor.u32 %v2802_v0, %v2401_v63  ;;  %v2792_v43 = vld [vmem:[#allocation6 + $0x6c] sm:$0xf]  ;;  %v2449_v63 = vld [vmem:[#allocation6 + $0x108] sm:$0xf] }
 0x290   :  { %vm1018_vm2 = vmor %vm1016_vm1, %vm1017_vm0  ;;  %v2814_v0 = vld [vmem:[#allocation6 + $0x114] sm:$0xf0] }
 0x291   :  { %v1025_v16 = vmul.f32 %v3232_v37, %v1024_v6  ;;  %v1012_v17 = vmul.f32 %v3239_v2, %v1011_v8  ;;  %1572 = vmatpush.bf16.msra.mxu1 %v2550_v36  ;;  %1532 = vmatpush.bf16.msrb.mxu2 %v2434_v38  ;;  %v2403_v6 = vld [vmem:[#allocation6 + $0xb8] sm:$0xf0]  ;;  %v2518_v8 = vor.u32 %v2828_v55, %v2515_v60  ;;  %v2790_v55 = vld [vmem:[#allocation6 + $0x54] sm:$0xf0] }
 0x292   :  { %1545 = vmatpush.bf16.msrb.mxu3 %v2562_v3  ;;  %v2422_v3 = vor.u32 %v2804_v47, %v2419_v54  ;;  %v2406_v12 = vor.u32 %v2800_v5, %v2403_v6  ;;  %v2467_v54 = vld [vmem:[#allocation6 + $0x138] sm:$0xf0]  ;;  %v2786_v6 = vld [vmem:[#allocation6 + $0x34] sm:$0xf0] }
 0x293   :  { %v1029_v27 = vsel %vm3244_vm15, %v3232_v37, %v1025_v16  ;;  %v1013_v30 = vmul.f32 0.5, %v1012_v17  ;;  %v2417_v37 = vld [vmem:[#allocation6 + $0xc8] sm:$0xf]  ;;  %1558 = vmatpush.bf16.msra.mxu0 %v2438_v45  ;;  %v2826_v16 = vld [vmem:[#allocation6 + $0x174] sm:$0xf0] }
 0x294   :  { %v1031_v35 = vmul.f32 %v2943_v34, %v1029_v27  ;;  %v2418_v13 = vor.u32 %v2806_v44, %v2417_v37  ;;  %v2824_v17 = vld [vmem:[#allocation6 + $0x16c] sm:$0xf]  ;;  %v2498_v20 = vor.u32 %v2826_v16, %v2497_v15  ;;  %v2387_v27 = vld [vmem:[#allocation6 + $0x98] sm:$0xf0] }
 0x295   :  { %v1014_v42 = vsub.f32 1.5, %v1013_v30  ;;  %1573 = vmatpush.bf16.msra.mxu1 %v2534_v58  ;;  %v2502_v23 = vor.u32 %v2824_v17, %v2499_v21  ;;  %v2481_v30 = vld [vmem:[#allocation6 + $0x148] sm:$0xf]  ;;  %v2390_v31 = vor.u32 %v2796_v26, %v2387_v27  ;;  %v2483_v34 = vld [vmem:[#allocation6 + $0x158] sm:$0xf0] }
 0x296   :  { %1546 = vmatpush.bf16.msrb.mxu3 %v2546_v29  ;;  %v1033_v52 = vmul.f32 %v1031_v35, %v3216_v22  ;;  %v1043_v62 = vperm.slane %v1031_v35, 7  ;;  %1533 = vmatpush.bf16.msrb.mxu2 %v2418_v13  ;;  %v2385_v29 = vld [vmem:[#allocation6 + $0x88] sm:$0xf]  ;;  %v2482_v36 = vor.u32 %v2822_v32, %v2481_v30  ;;  %v2486_v38 = vor.u32 %v2820_v33, %v2483_v34  ;;  %v2371_v45 = vld [vmem:[#allocation6 + $0x78] sm:$0xf0] }
 0x297   :  { %v1015_v53 = vmul.f32 %v3239_v2, %v1014_v42  ;;  %1559 = vmatpush.bf16.msra.mxu0 %v2422_v3  ;;  %v2386_v25 = vor.u32 %v2798_v24, %v2385_v29  ;;  %v2794_v42 = vld [vmem:[#allocation6 + $0x74] sm:$0xf0]  ;;  %v2353_v13 = vld [vmem:[#allocation6 + $0x48] sm:$0xf]  ;;  %v2451_v3 = vld [vmem:[#allocation6 + $0x118] sm:$0xf0] }
 0x298   :  { %v1037_v28 = vrot.slane %v1033_v52, 7  ;;  %v1045_v59 = vmul.f32 %v1043_v62, %v3202_v48  ;;  %v2370_v44 = vor.u32 %v2794_v42, %v2369_v41  ;;  %v2818_v52 = vld [vmem:[#allocation6 + $0x134] sm:$0xf0]  ;;  %v2354_v60 = vor.u32 %v2790_v55, %v2353_v13  ;;  %v2788_v62 = vld [vmem:[#allocation6 + $0x4c] sm:$0xf]  ;;  %v2873_v13 = vld [vmem:[#allocation7 + $0xf0] sm:$0xff] }
 0x299   :  { %v1019_v22 = vsel %vm1018_vm2, %v3239_v2, %v1015_v53  ;;  %1574 = vmatpush.bf16.msra.mxu1 %v2518_v8  ;;  %v2816_v53 = vld [vmem:[#allocation6 + $0x12c] sm:$0xf]  ;;  %v2846_v55 = vld [vmem:[#allocation7 + $0x18] sm:$0xff] }
 0x29a   :  { %v1030_v1 = vmul.f32 %v2944_v18, %v1019_v22  ;;  %1547 = vmatpush.bf16.msrb.mxu3 %v2530_v46  ;;  %v1041_v7 = vsub.f32 %v3256_v50, %v1037_v28  ;;  %1534 = vmatpush.bf16.msrb.mxu2 %v2402_v9  ;;  %v2465_v46 = vld [vmem:[#allocation6 + $0x128] sm:$0xf]  ;;  %v2470_v58 = vor.u32 %v2816_v53, %v2467_v54  ;;  %v2355_v22 = vld [vmem:[#allocation6 + $0x58] sm:$0xf0]  ;;  %v2780_v17 = vld [vmem:[#allocation6 + $0xc] sm:$0xf] }
 0x29b   :  { %1560 = vmatpush.bf16.msra.mxu0 %v2406_v12  ;;  %v2466_v51 = vor.u32 %v2818_v52, %v2465_v46  ;;  %v2358_v28 = vor.u32 %v2788_v62, %v2355_v22  ;;  %v2450_v18 = vor.u32 %v2814_v0, %v2449_v63  ;;  %v2339_v9 = vld [vmem:[#allocation6 + $0x38] sm:$0xf0]  ;;  %v2321_v12 = vld [vmem:[#allocation6 + $0x8] sm:$0xf]  ;;  %v2855_v52 = vld [vmem:[#allocation7 + $0x60] sm:$0xff]  ;;  %v1157_v62 = vperm.slane %v3256_v50, 1 }
 0x29c   :  { %v1032_v2 = vmul.f32 %v1030_v1, %v3222_v56  ;;  %v1047_v10 = vperm.slane %v1041_v7, 0  ;;  %v1042_v19 = vperm.slane %v1030_v1, 7  ;;  %v2812_v1 = vld [vmem:[#allocation6 + $0x10c] sm:$0xf]  ;;  %v2850_v46 = vld [vmem:[#allocation7 + $0x38] sm:$0xff]  ;;  %v1156_v50 = vperm.slane %v3267_v11, 1 }
 0x29d   :  { %1575 = vmatpush.bf16.msra.mxu1 %v2502_v23  ;;  %v2454_v5 = vor.u32 %v2812_v1, %v2451_v3  ;;  %v2784_v7 = vld [vmem:[#allocation6 + $0x2c] sm:$0xf]  ;;  %v2854_v53 = vld [vmem:[#allocation7 + $0x58] sm:$0xff] }
 0x29e   :  { %1548 = vmatpush.bf16.msrb.mxu3 %v2514_v4  ;;  %v1036_v49 = vrot.slane %v1032_v2, 7  ;;  %v3269_v14 = vadd.f32 %v1047_v10, %v1045_v59  ;;  %v1044_v35 = vmul.f32 %v1042_v19, %v3209_v61  ;;  %1535 = vmatpush.bf16.msrb.mxu2 %v2386_v25  ;;  %v2374_v61 = vor.u32 %v2792_v43, %v2371_v45  ;;  %v2337_v4 = vld [vmem:[#allocation6 + $0x28] sm:$0xf]  ;;  %v2323_v19 = vld [vmem:[#allocation6 + $0x18] sm:$0xf0]  ;;  %v2857_v45 = vld [vmem:[#allocation7 + $0x70] sm:$0xff] }
 0x29f   :  { %1561 = vmatpush.bf16.msra.mxu0 %v2390_v31  ;;  %v2338_v8 = vor.u32 %v2786_v6, %v2337_v4  ;;  %v2342_v59 = vor.u32 %v2784_v7, %v2339_v9  ;;  %v2326_v21 = vor.u32 %v2780_v17, %v2323_v19  ;;  %v2874_v54 = vld [vmem:[#allocation7 + $0xf8] sm:$0xff]  ;;  %v2852_v22 = vld [vmem:[#allocation7 + $0x48] sm:$0xff]  ;;  %v2871_v6 = vld [vmem:[#allocation7 + $0xe0] sm:$0xff] }
 0x2a0   :  { %v1040_v56 = vsub.f32 %v3267_v11, %v1036_v49  ;;  %v2310_v48 = vmul.f32 -1.442695, %v3269_v14  ;;  %v2782_v49 = vld [vmem:[#allocation6 + $0x14] sm:$0xf0]  ;;  %v2872_v63 = vld [vmem:[#allocation7 + $0xe8] sm:$0xff] }
 0x2a1   :  { %1576 = vmatpush.bf16.msra.mxu1 %v2486_v38  ;;  %v2322_v16 = vor.u32 %v2782_v49, %v2321_v12  ;;  %v2864_v9 = vld [vmem:[#allocation7 + $0xa8] sm:$0xff] }
 0x2a2   :  { %1549 = vmatpush.bf16.msrb.mxu3 %v2498_v20  ;;  %2919 = vpow2.f32 %v2310_v48  ;;  %v1046_v39 = vperm.slane %v1040_v56, 0  ;;  %1536 = vmatpush.bf16.msrb.mxu2 %v2370_v44 }
 0x2a3   :  { %1562 = vmatpush.bf16.msra.mxu0 %v2374_v61  ;;  %v2849_v61 = vld [vmem:[#allocation7 + $0x30] sm:$0xff] }
 0x2a4   :  { %v3274_v40 = vadd.f32 %v1046_v39, %v1044_v35 }
 0x2a5   :  { %1577 = vmatpush.bf16.msra.mxu1 %v2470_v58  ;;  %v2853_v58 = vld [vmem:[#allocation7 + $0x50] sm:$0xff] }
 0x2a6   :  { %1550 = vmatpush.bf16.msrb.mxu3 %v2482_v36  ;;  %v2309_v37 = vmul.f32 -1.442695, %v3274_v40  ;;  %1537 = vmatpush.bf16.msrb.mxu2 %v2354_v60  ;;  %v2866_v60 = vld [vmem:[#allocation7 + $0xb8] sm:$0xff] }
 0x2a7   :  { %1563 = vmatpush.bf16.msra.mxu0 %v2358_v28  ;;  %v2845_v28 = vld [vmem:[#allocation7 + $0x10] sm:$0xff] }
 0x2a8   :  { %v2920_v47 = vpop.eup %2919  ;;  %2921 = vpow2.f32 %v2309_v37 }
 0x2a9   :  { %v1057_v57 = vadd.f32 1.0, %v2920_v47  ;;  %1578 = vmatpush.bf16.msra.mxu1 %v2454_v5  ;;  %v2856_v47 = vld [vmem:[#allocation7 + $0x68] sm:$0xff]  ;;  %v2851_v5 = vld [vmem:[#allocation7 + $0x40] sm:$0xff] }
 0x2aa   :  { %1551 = vmatpush.bf16.msrb.mxu3 %v2466_v51  ;;  %1538 = vmatpush.bf16.msrb.mxu2 %v2338_v8  ;;  %v2844_v8 = vld [vmem:[#allocation7 + $0x8] sm:$0xff] }
 0x2ab   :  { %2923 = vrcp.f32 %v1057_v57  ;;  %1564 = vmatpush.bf16.msra.mxu0 %v2342_v59  ;;  %v1084_v48 = vand.u32 2147483648, %v1057_v57  ;;  %v1082_v29 = vand.u32 2147483647, %v1057_v57  ;;  %vm1078_vm4 = vweird.f32 %v1057_v57  ;;  %v2870_v59 = vld [vmem:[#allocation7 + $0xd8] sm:$0xff] }
 0x2ad   :  { %v1085_v26 = vor.u32 1.1754944e-38, %v1084_v48  ;;  %vm1083_vm6 = vcmp.eq.f32.partialorder %v1082_v29, 8.507059e+37 }
 0x2ae   :  { %v2922_v2 = vpop.eup %2921  ;;  %1552 = vmatpush.bf16.msrb.mxu3 %v2450_v18  ;;  %1539 = vmatpush.bf16.msrb.mxu2 %v2322_v16  ;;  %v2865_v18 = vld [vmem:[#allocation7 + $0xb0] sm:$0xff]  ;;  %v2863_v16 = vld [vmem:[#allocation7 + $0xa0] sm:$0xff] }
 0x2af   :  { %v1056_v10 = vadd.f32 1.0, %v2922_v2  ;;  %1565 = vmatpush.bf16.msra.mxu0 %v2326_v21  ;;  %v2869_v21 = vld [vmem:[#allocation7 + $0xd0] sm:$0xff] }
 0x2b1   :  { %v2924_v15 = vpop.eup %2923  ;;  %2925 = vrcp.f32 %v1056_v10  ;;  %v1069_v34 = vand.u32 2147483648, %v1056_v10  ;;  %v1067_v36 = vand.u32 2147483647, %v1056_v10  ;;  %vm1063_vm8 = vweird.f32 %v1056_v10 }
 0x2b2   :  { %v1074_v20 = vmul.f32 %v2924_v15, %v1057_v57  ;;  %vm1079_vm3 = vweird.f32 %v2924_v15  ;;  %v2847_v57 = vld [vmem:[#allocation7 + $0x20] sm:$0xff] }
 0x2b3   :  { %vm1080_vm5 = vmor %vm1078_vm4, %vm1079_vm3  ;;  %v1070_v41 = vor.u32 1.1754944e-38, %v1069_v34  ;;  %vm1068_vm10 = vcmp.eq.f32.partialorder %v1067_v36, 8.507059e+37  ;;  %v2867_v36 = vld [vmem:[#allocation7 + $0xc0] sm:$0xff] }
 0x2b4   :  { %v1075_v56 = vsub.f32 1.0, %v1074_v20 }
 0x2b6   :  { %v1076_v23 = vmul.f32 %v2924_v15, %v1075_v56  ;;  %v107_v56 = vld [vmem:[#allocation9 + $0x38] sm:$0xff] }
 0x2b7   :  { %v2926_v24 = vpop.eup %2925 }
 0x2b8   :  { %v1077_v25 = vadd.f32 %v2924_v15, %v1076_v23  ;;  %v1059_v27 = vmul.f32 %v2926_v24, %v1056_v10  ;;  %vm1064_vm7 = vweird.f32 %v2926_v24  ;;  %v2862_v23 = vld [vmem:[#allocation7 + $0x98] sm:$0xff] }
 0x2b9   :  { %vm1065_vm9 = vmor %vm1063_vm8, %vm1064_vm7 }
 0x2ba   :  { %v1081_v30 = vsel %vm1080_vm5, %v2924_v15, %v1077_v25  ;;  %v1060_v32 = vsub.f32 1.0, %v1059_v27  ;;  %v2843_v15 = vld [vmem:[#allocation7] sm:$0xff]  ;;  %v2868_v25 = vld [vmem:[#allocation7 + $0xc8] sm:$0xff] }
 0x2bb   :  { %v1086_v31 = vsel %vm1083_vm6, %v1085_v26, %v1081_v30 }
 0x2bc   :  { %v1089_v33 = vmul.f32 %v1086_v31, %v3269_v14  ;;  %v1061_v35 = vmul.f32 %v2926_v24, %v1060_v32  ;;  %v2858_v14 = vld [vmem:[#allocation7 + $0x78] sm:$0xff]  ;;  %v2861_v31 = vld [vmem:[#allocation7 + $0x90] sm:$0xff] }
 0x2be   :  { %v1155_v38 = vpack.c.bf16 %v1089_v33, %v1089_v33  ;;  %v1062_v39 = vadd.f32 %v2926_v24, %v1061_v35  ;;  %v106_v33 = vld [vmem:[#allocation9 + $0x30] sm:$0xff] }
 0x2c0   :  { %1501 = vmatmul.bf16.vlgmr.msra.gmra.mxu3 %v1155_v38  ;;  %1527 = vmatmul.bf16.vlgmr.msrb.gmra.mxu1 %v1155_v38  ;;  %v1066_v42 = vsel %vm1065_vm9, %v2926_v24, %v1062_v39  ;;  %v1159_v24 = vperm.slane %v107_v56, 1 }
 0x2c1   :  { %v1071_v43 = vsel %vm1068_vm10, %v1070_v41, %v1066_v42  ;;  %1938 = vmatpush.bf16.msra.mxu3 %v2858_v14  ;;  %1964 = vmatpush.bf16.msrb.mxu1 %v2874_v54  ;;  %v1158_v41 = vperm.slane %v106_v33, 1  ;;  %v2860_v42 = vld [vmem:[#allocation7 + $0x88] sm:$0xff] }
 0x2c2   :  { %v1088_v37 = vmul.f32 %v1071_v43, %v3274_v40  ;;  %v2848_v40 = vld [vmem:[#allocation7 + $0x28] sm:$0xff] }
 0x2c4   :  { %v1154_v44 = vpack.c.bf16 %v1088_v37, %v1088_v37 }
 0x2c5   :  { %1939 = vmatpush.bf16.msra.mxu3 %v2857_v45  ;;  %1965 = vmatpush.bf16.msrb.mxu1 %v2873_v13 }
 0x2c6   :  { %1488 = vmatmul.bf16.vlgmr.msra.gmra.mxu2 %v1154_v44  ;;  %1514 = vmatmul.bf16.vlgmr.msrb.gmra.mxu0 %v1154_v44 }
 0x2c7   :  { %1925 = vmatpush.bf16.msra.mxu2 %v2850_v46  ;;  %1951 = vmatpush.bf16.msrb.mxu0 %v2866_v60 }
 0x2c9   :  { %1940 = vmatpush.bf16.msra.mxu3 %v2856_v47  ;;  %1966 = vmatpush.bf16.msrb.mxu1 %v2872_v63 }
 0x2cb   :  { %1926 = vmatpush.bf16.msra.mxu2 %v2849_v61  ;;  %1952 = vmatpush.bf16.msrb.mxu0 %v2865_v18  ;;  %v2859_v61 = vld [vmem:[#allocation7 + $0x80] sm:$0xff] }
 0x2cd   :  { %1941 = vmatpush.bf16.msra.mxu3 %v2855_v52  ;;  %1967 = vmatpush.bf16.msrb.mxu1 %v2871_v6 }
 0x2cf   :  { %1927 = vmatpush.bf16.msra.mxu2 %v2848_v40  ;;  %1953 = vmatpush.bf16.msrb.mxu0 %v2864_v9 }
 0x2d0   :  { %1553 = vmatmul.bf16.vlgmr.msrb.gmra.mxu3 %v1155_v38  ;;  %1579 = vmatmul.bf16.vlgmr.msra.gmra.mxu1 %v1155_v38 }
 0x2d1   :  { %1942 = vmatpush.bf16.msra.mxu3 %v2854_v53  ;;  %1968 = vmatpush.bf16.msrb.mxu1 %v2870_v59 }
 0x2d3   :  { %1928 = vmatpush.bf16.msra.mxu2 %v2847_v57  ;;  %1954 = vmatpush.bf16.msrb.mxu0 %v2863_v16 }
 0x2d5   :  { %1943 = vmatpush.bf16.msra.mxu3 %v2853_v58  ;;  %1969 = vmatpush.bf16.msrb.mxu1 %v2869_v21 }
 0x2d6   :  { %1540 = vmatmul.bf16.vlgmr.msrb.gmra.mxu2 %v1154_v44  ;;  %1566 = vmatmul.bf16.vlgmr.msra.gmra.mxu0 %v1154_v44 }
 0x2d7   :  { %1929 = vmatpush.bf16.msra.mxu2 %v2846_v55  ;;  %1955 = vmatpush.bf16.msrb.mxu0 %v2862_v23 }
 0x2d9   :  { %1944 = vmatpush.bf16.msra.mxu3 %v2852_v22  ;;  %1970 = vmatpush.bf16.msrb.mxu1 %v2868_v25 }
 0x2db   :  { %1930 = vmatpush.bf16.msra.mxu2 %v2845_v28  ;;  %1956 = vmatpush.bf16.msrb.mxu0 %v2861_v31 }
 0x2dd   :  { %1945 = vmatpush.bf16.msra.mxu3 %v2851_v5  ;;  %1971 = vmatpush.bf16.msrb.mxu1 %v2867_v36 }
 0x2df   :  { %1931 = vmatpush.bf16.msra.mxu2 %v2844_v8  ;;  %1957 = vmatpush.bf16.msrb.mxu0 %v2860_v42 }
 0x2e3   :  { %1932 = vmatpush.bf16.msra.mxu2 %v2843_v15  ;;  %1958 = vmatpush.bf16.msrb.mxu0 %v2859_v61 }
 0x33d   :  { %v1528_v51 = vpop.f32.mrf.mxu1 }
 0x343   :  { %v1502_v0 = vpop.f32.mrf.mxu3  ;;  %v1515_v1 = vpop.f32.mrf.mxu0 }
 0x344   :  { %v1516_v3 = vadd.f32 %v1515_v1, %v1157_v62 }
 0x345   :  { %v1530_v4 = vpop.f32.mrf.mxu1 }
 0x346   :  { %v3280_v7 = vadd.f32 %v1528_v51, %v1516_v3 }
 0x348   :  { %v2568_v2 = vmul.f32 -1.442695, %v3280_v7 }
 0x349   :  { %v1489_v10 = vpop.f32.mrf.mxu2 }
 0x34a   :  { %2927 = vpow2.f32 %v2568_v2  ;;  %v1490_v12 = vadd.f32 %v1489_v10, %v1156_v50 }
 0x34b   :  { %v1504_v49 = vpop.f32.mrf.mxu3  ;;  %v1517_v17 = vpop.f32.mrf.mxu0 }
 0x34c   :  { %v3284_v19 = vadd.f32 %v1502_v0, %v1490_v12 }
 0x34d   :  { %v1580_v20 = vpop.f32.mrf.mxu1 }
 0x34e   :  { %v2567_v48 = vmul.f32 -1.442695, %v3284_v19 }
 0x350   :  { %v2928_v29 = vpop.eup %2927  ;;  %2929 = vpow2.f32 %v2567_v48 }
 0x351   :  { %v1597_v26 = vadd.f32 1.0, %v2928_v29  ;;  %v1491_v27 = vpop.f32.mrf.mxu2 }
 0x353   :  { %v1554_v30 = vpop.f32.mrf.mxu3  ;;  %2931 = vrcp.f32 %v1597_v26  ;;  %v1567_v32 = vpop.f32.mrf.mxu0  ;;  %v1626_v54 = vand.u32 2147483648, %v1597_v26  ;;  %v1624_v51 = vand.u32 2147483647, %v1597_v26  ;;  %vm1620_vm12 = vweird.f32 %v1597_v26 }
 0x354   :  { %v1568_v34 = vadd.f32 %v1567_v32, %v1159_v24 }
 0x355   :  { %v1582_v35 = vpop.f32.mrf.mxu1  ;;  %v1627_v22 = vor.u32 1.1754944e-38, %v1626_v54  ;;  %vm1625_vm14 = vcmp.eq.f32.partialorder %v1624_v51, 8.507059e+37 }
 0x356   :  { %v2930_v38 = vpop.eup %2929  ;;  %v3287_v39 = vadd.f32 %v1580_v20, %v1568_v34 }
 0x357   :  { %v1596_v43 = vadd.f32 1.0, %v2930_v38 }
 0x358   :  { %v2570_v37 = vmul.f32 -1.442695, %v3287_v39 }
 0x359   :  { %v2932_v44 = vpop.eup %2931  ;;  %2933 = vrcp.f32 %v1596_v43  ;;  %v1541_v14 = vpop.f32.mrf.mxu2  ;;  %v1611_v3 = vand.u32 2147483648, %v1596_v43  ;;  %v1609_v6 = vand.u32 2147483647, %v1596_v43  ;;  %vm1605_vm0 = vweird.f32 %v1596_v43 }
 0x35a   :  { %v1616_v45 = vmul.f32 %v2932_v44, %v1597_v26  ;;  %2935 = vpow2.f32 %v2570_v37  ;;  %v1542_v46 = vadd.f32 %v1541_v14, %v1158_v41  ;;  %vm1621_vm11 = vweird.f32 %v2932_v44 }
 0x35b   :  { %v1556_v47 = vpop.f32.mrf.mxu3  ;;  %v1569_v52 = vpop.f32.mrf.mxu0  ;;  %vm1622_vm13 = vmor %vm1620_vm12, %vm1621_vm11  ;;  %v1612_v2 = vor.u32 1.1754944e-38, %v1611_v3  ;;  %vm1610_vm2 = vcmp.eq.f32.partialorder %v1609_v6, 8.507059e+37 }
 0x35c   :  { %v1617_v40 = vsub.f32 1.0, %v1616_v45  ;;  %v3290_v53 = vadd.f32 %v1554_v30, %v1542_v46 }
 0x35e   :  { %v1618_v57 = vmul.f32 %v2932_v44, %v1617_v40  ;;  %v2569_v58 = vmul.f32 -1.442695, %v3290_v53 }
 0x35f   :  { %v2934_v13 = vpop.eup %2933 }
 0x360   :  { %v2936_v55 = vpop.eup %2935  ;;  %v1619_v60 = vadd.f32 %v2932_v44, %v1618_v57  ;;  %v1601_v62 = vmul.f32 %v2934_v13, %v1596_v43  ;;  %2937 = vpow2.f32 %v2569_v58  ;;  %vm1606_vm15 = vweird.f32 %v2934_v13 }
 0x361   :  { %v1599_v63 = vadd.f32 1.0, %v2936_v55  ;;  %v1543_v0 = vpop.f32.mrf.mxu2  ;;  %vm1607_vm1 = vmor %vm1605_vm0, %vm1606_vm15 }
 0x362   :  { %v1623_v28 = vsel %vm1622_vm13, %v2932_v44, %v1619_v60  ;;  %v1602_v18 = vsub.f32 1.0, %v1601_v62 }
 0x363   :  { %v1628_v1 = vsel %vm1625_vm14, %v1627_v22, %v1623_v28  ;;  %2939 = vrcp.f32 %v1599_v63  ;;  %v1656_v20 = vand.u32 2147483648, %v1599_v63  ;;  %v1654_v56 = vand.u32 2147483647, %v1599_v63 }
 0x364   :  { %v1661_v4 = vmul.f32 %v1628_v1, %v3280_v7  ;;  %v1603_v5 = vmul.f32 %v2934_v13, %v1602_v18  ;;  %vm1650_vm4 = vweird.f32 %v1599_v63 }
 0x365   :  { %v1657_v24 = vor.u32 1.1754944e-38, %v1656_v20  ;;  %vm1655_vm6 = vcmp.eq.f32.partialorder %v1654_v56, 8.507059e+37 }
 0x366   :  { %v2938_v50 = vpop.eup %2937  ;;  %v1729_v8 = vpack.c.bf16 %v1661_v4, %v1661_v4  ;;  %v1604_v9 = vadd.f32 %v2934_v13, %v1603_v5 }
 0x367   :  { %v1598_v59 = vadd.f32 1.0, %v2938_v50 }
 0x368   :  { %v1608_v10 = vsel %vm1607_vm1, %v2934_v13, %v1604_v9  ;;  %1946 = vmatmul.bf16.vlgmr.msra.gmra.mxu3 %v1729_v8 }
 0x369   :  { %v2940_v12 = vpop.eup %2939  ;;  %v1613_v49 = vsel %vm1610_vm2, %v1612_v2, %v1608_v10  ;;  %2941 = vrcp.f32 %v1598_v59  ;;  %v1641_v30 = vand.u32 2147483648, %v1598_v59  ;;  %v1639_v32 = vand.u32 2147483647, %v1598_v59 }
 0x36a   :  { %v1660_v15 = vmul.f32 %v1613_v49, %v3284_v19  ;;  %v1646_v16 = vmul.f32 %v2940_v12, %v1599_v63  ;;  %vm1651_vm3 = vweird.f32 %v2940_v12  ;;  %vm1635_vm8 = vweird.f32 %v1598_v59 }
 0x36b   :  { %vm1652_vm5 = vmor %vm1650_vm4, %vm1651_vm3  ;;  %v1642_v35 = vor.u32 1.1754944e-38, %v1641_v30  ;;  %vm1640_vm10 = vcmp.eq.f32.partialorder %v1639_v32, 8.507059e+37 }
 0x36c   :  { %v1728_v7 = vpack.c.bf16 %v1660_v15, %v1660_v15  ;;  %v1647_v17 = vsub.f32 1.0, %v1646_v16 }
 0x36e   :  { %v1648_v21 = vmul.f32 %v2940_v12, %v1647_v17  ;;  %1933 = vmatmul.bf16.vlgmr.msra.gmra.mxu2 %v1728_v7 }
 0x36f   :  { %v2942_v48 = vpop.eup %2941 }
 0x370   :  { %v1649_v23 = vadd.f32 %v2940_v12, %v1648_v21  ;;  %v1631_v29 = vmul.f32 %v2942_v48, %v1598_v59  ;;  %vm1636_vm7 = vweird.f32 %v2942_v48 }
 0x371   :  { %vm1637_vm9 = vmor %vm1635_vm8, %vm1636_vm7 }
 0x372   :  { %v1653_v25 = vsel %vm1652_vm5, %v2940_v12, %v1649_v23  ;;  %v1632_v26 = vsub.f32 1.0, %v1631_v29 }
 0x373   :  { %v1658_v27 = vsel %vm1655_vm6, %v1657_v24, %v1653_v25 }
 0x374   :  { %v1663_v19 = vmul.f32 %v1658_v27, %v3287_v39  ;;  %v1633_v31 = vmul.f32 %v2942_v48, %v1632_v26  ;;  %v1732_v39 = vperm.slane %v3267_v11, 2 }
 0x376   :  { %v1731_v33 = vpack.c.bf16 %v1663_v19, %v1663_v19  ;;  %v1634_v34 = vadd.f32 %v2942_v48, %v1633_v31 }
 0x378   :  { %v1638_v36 = vsel %vm1637_vm9, %v2942_v48, %v1634_v34  ;;  %1972 = vmatmul.bf16.vlgmr.msrb.gmra.mxu1 %v1731_v33 }
 0x379   :  { %v1643_v38 = vsel %vm1640_vm10, %v1642_v35, %v1638_v36 }
 0x37a   :  { %v1662_v41 = vmul.f32 %v1643_v38, %v3290_v53 }
 0x37c   :  { %v1730_v42 = vpack.c.bf16 %v1662_v41, %v1662_v41 }
 0x37e   :  { %1959 = vmatmul.bf16.vlgmr.msrb.gmra.mxu0 %v1730_v42 }
 0x3eb   :  { %v1947_v43 = vpop.f32.mrf.mxu3 }
 0x3f1   :  { %v1934_v37 = vpop.f32.mrf.mxu2 }
 0x3f2   :  { %v1935_v45 = vadd.f32 %v1934_v37, %v1732_v39 }
 0x3f3   :  { %v1949_v44 = vpop.f32.mrf.mxu3 }
 0x3f4   :  { %v1948_v47 = vadd.f32 %v1947_v43, %v1935_v45 }
 0x3f5   :  { %v1973_v14 = vpop.f32.mrf.mxu1 }
 0x3f9   :  { %v1936_v46 = vpop.f32.mrf.mxu2 }
 0x3fb   :  { %v1960_v61 = vpop.f32.mrf.mxu0 }
 0x3fc   :  { %v1961_v52 = vadd.f32 %v1960_v61, %v1948_v47 }
 0x3fd   :  { %v1975_v40 = vpop.f32.mrf.mxu1 }
 0x3fe   :  { %v1974_v54 = vadd.f32 %v1973_v14, %v1961_v52 }
 0x400   :  { %1977 = vst [vmem:[%s3307_s6] sm:$0xff] %v1974_v54 }
 0x403   :  { %v1962_v53 = vpop.f32.mrf.mxu0 }
 0x404   :  { %1982 = vsyncpa [#allocation3], 1 }
 0x405   :  { %1983 = vsyncpa [#allocation5], 1 }
 0x406   :  { %1984 = vsyncpa [#allocation8], 1 }

</bundles_post_ra>
